<compile_context>
chip_gen: v6e
topology: v6e:2x2x1
jax: 0.10.0
libtpu: 0.0.40
codegen_flags: <defaults>
</compile_context>

<pallas_src>
import jax
import jax.numpy as jnp
from jax import lax
from jax.experimental import pallas as pl
from jax.experimental.pallas import tpu as pltpu


def pam_kernel(xq_ref, xk_ref, wqt_ref, bq_ref, wkt_ref, bk_ref, wvt_ref,
               bv_ref, gamma_ref, out_ref, q_scr, m_scr, l_scr, acc_scr):
    ki = pl.program_id(2)

    @pl.when(ki == 0)
    def _init():
        m_scr[...] = jnp.full(m_scr.shape, -jnp.inf, dtype=jnp.float32)
        l_scr[...] = jnp.zeros(l_scr.shape, dtype=jnp.float32)
        acc_scr[...] = jnp.zeros(acc_scr.shape, dtype=jnp.float32)
        # q projection for this query tile, computed once per (b, qi) and
        # reused across all kv steps.
        xq = xq_ref[0].astype(jnp.bfloat16)                        # (TQ, C)
        q = jnp.dot(xq, wqt_ref[...],
                    preferred_element_type=jnp.float32) + bq_ref[...]
        q_scr[...] = q.astype(jnp.bfloat16)                        # (TQ, C8p)

    # k / v projections for the current kv tile (bf16 MXU, f32 accumulate).
    xk = xk_ref[0].astype(jnp.bfloat16)                            # (TK, C)
    k = jnp.dot(xk, wkt_ref[...], preferred_element_type=jnp.float32) + bk_ref[...]
    v = jnp.dot(xk, wvt_ref[...], preferred_element_type=jnp.float32) + bv_ref[...]

    # energy tile = q @ k^T via trans-B contraction (no in-kernel transpose).
    s = lax.dot_general(q_scr[...], k.astype(jnp.bfloat16),
                        (((1,), (1,)), ((), ())),
                        preferred_element_type=jnp.float32)        # (TQ, TK)

    # Online (flash) softmax update.
    m_prev = m_scr[...]
    m_new = jnp.maximum(m_prev, jnp.max(s, axis=-1, keepdims=True))
    alpha = jnp.exp(m_prev - m_new)
    p = jnp.exp(s - m_new)
    l_scr[...] = alpha * l_scr[...] + jnp.sum(p, axis=-1, keepdims=True)
    acc_scr[...] = alpha * acc_scr[...] + jnp.dot(
        p.astype(jnp.bfloat16), v.astype(jnp.bfloat16),
        preferred_element_type=jnp.float32)
    m_scr[...] = m_new

    @pl.when(ki == pl.num_programs(2) - 1)
    def _finalize():
        gamma = gamma_ref[0]                                       # SMEM scalar
        inv_l = pl.reciprocal(l_scr[...], approx=True)             # EUP slot
        out_ref[0] = gamma * (acc_scr[...] * inv_l) + xq_ref[0]


def _pick_tile(hw):
    # MXU/lane-friendly tiles; prefer ones that give >= 2 grid steps.
    for t in (256, 128):
        if hw % t == 0 and hw // t >= 2:
            return t
    for t in (256, 128, 64, 32, 16, 8):
        if hw % t == 0:
            return t
    return hw


def pam_forward(x_nchw, wq, bq, wk, bk, wv, bv, gamma):
    B, C, H, W = x_nchw.shape
    HW = H * W
    C8 = wq.shape[0]
    C8p = ((C8 + 127) // 128) * 128    # pad q/k channels up to a full lane width

    TQ = _pick_tile(HW)
    TK = TQ
    nq = HW // TQ
    nk = HW // TK

    # glue: NCHW -> (B, HW, C) so channels sit on the lane axis.
    # TODO(synk): accept NHWC end-to-end to drop the two wrapper transposes.
    x = jnp.transpose(x_nchw.reshape(B, C, HW), (0, 2, 1)).astype(jnp.float32)

    # Zero-pad q/k projections to C8p output channels (zero channels are exact
    # no-ops in the energy), pre-transpose, cast weights to bf16 for the MXU.
    wq_p = jnp.zeros((C8p, C), jnp.float32).at[:C8].set(wq.astype(jnp.float32))
    wk_p = jnp.zeros((C8p, C), jnp.float32).at[:C8].set(wk.astype(jnp.float32))
    wqt = wq_p.T.astype(jnp.bfloat16)                                  # (C, C8p)
    wkt = wk_p.T.astype(jnp.bfloat16)                                  # (C, C8p)
    wvt = jnp.transpose(wv.astype(jnp.float32)).astype(jnp.bfloat16)   # (C, C)

    bq_p = jnp.zeros((1, C8p), jnp.float32).at[0, :C8].set(bq.astype(jnp.float32))
    bk_p = jnp.zeros((1, C8p), jnp.float32).at[0, :C8].set(bk.astype(jnp.float32))
    bv2 = bv.reshape(1, C).astype(jnp.float32)
    gamma1 = gamma.reshape(1).astype(jnp.float32)

    cost = pl.CostEstimate(
        flops=2 * B * HW * C * (2 * C8p + C) + 2 * B * HW * HW * (C8p + C),
        transcendentals=B * HW * HW,
        bytes_accessed=2 * B * HW * C * 4 + 2 * (2 * C * C8p + C * C)
        + 4 * (2 * C8p + C + 1),
    )

    out = pl.pallas_call(
        pam_kernel,
        out_shape=jax.ShapeDtypeStruct((B, HW, C), jnp.float32),
        grid_spec=pltpu.PrefetchScalarGridSpec(
            num_scalar_prefetch=0,
            grid=(B, nq, nk),
            in_specs=[
                pl.BlockSpec((1, TQ, C), lambda b, qi, ki: (b, qi, 0)),  # x (q rows)
                pl.BlockSpec((1, TK, C), lambda b, qi, ki: (b, ki, 0)),  # x (kv rows)
                pl.BlockSpec((C, C8p), lambda b, qi, ki: (0, 0)),        # Wq^T (bf16)
                pl.BlockSpec((1, C8p), lambda b, qi, ki: (0, 0)),        # bq
                pl.BlockSpec((C, C8p), lambda b, qi, ki: (0, 0)),        # Wk^T (bf16)
                pl.BlockSpec((1, C8p), lambda b, qi, ki: (0, 0)),        # bk
                pl.BlockSpec((C, C), lambda b, qi, ki: (0, 0)),          # Wv^T (bf16)
                pl.BlockSpec((1, C), lambda b, qi, ki: (0, 0)),          # bv
                pl.BlockSpec(memory_space=pltpu.MemorySpace.SMEM),       # gamma
            ],
            out_specs=pl.BlockSpec((1, TQ, C), lambda b, qi, ki: (b, qi, 0)),
            scratch_shapes=[
                pltpu.VMEM((TQ, C8p), jnp.bfloat16),   # q tile (bf16, reused over kv)
                pltpu.VMEM((TQ, 1), jnp.float32),      # running max m
                pltpu.VMEM((TQ, 1), jnp.float32),      # running denom l
                pltpu.VMEM((TQ, C), jnp.float32),      # f32 output accumulator
            ],
        ),
        compiler_params=pltpu.CompilerParams(
            dimension_semantics=("parallel", "parallel", "arbitrary"),
            vmem_limit_bytes=32 * 1024 * 1024),
        cost_estimate=cost,
    )(x, x, wqt, bq_p, wkt, bk_p, wvt, bv2, gamma1)

    # glue: (B, HW, C) -> NCHW
    return jnp.transpose(out, (0, 2, 1)).reshape(B, C, H, W)


def pam_reference(x_nchw, wq, bq, wk, bk, wv, bv, gamma):
    """Pure-JAX f32 reference mirroring the PyTorch forward."""
    B, C, H, W = x_nchw.shape
    HW = H * W
    x = x_nchw.reshape(B, C, HW)                                   # (B, C, HW)
    q = jnp.einsum('oc,bcn->bon', wq, x) + bq[None, :, None]       # (B, C8, HW)
    k = jnp.einsum('oc,bcn->bon', wk, x) + bk[None, :, None]
    v = jnp.einsum('oc,bcn->bon', wv, x) + bv[None, :, None]       # (B, C, HW)
    energy = jnp.einsum('bci,bcj->bij', q, k)                      # (B, HW, HW)
    attention = jax.nn.softmax(energy, axis=-1)
    out = jnp.einsum('bcj,bij->bci', v, attention)                 # (B, C, HW)
    out = out.reshape(B, C, H, W)
    return gamma[0] * out + x_nchw


if __name__ == "__main__":
    key = jax.random.PRNGKey(0)
    B, C, H, W = 2, 16, 16, 16          # in_dim must be >= 8 so in_dim // 8 >= 1
    C8 = C // 8

    keys = jax.random.split(key, 8)
    x = jax.random.normal(keys[0], (B, C, H, W), dtype=jnp.float32)

    # Conv2d 1x1 weights stored as (C_out, C_in).
    wq = jax.random.normal(keys[1], (C8, C), dtype=jnp.float32) * 0.1
    bq = jax.random.normal(keys[2], (C8,), dtype=jnp.float32) * 0.1
    wk = jax.random.normal(keys[3], (C8, C), dtype=jnp.float32) * 0.1
    bk = jax.random.normal(keys[4], (C8,), dtype=jnp.float32) * 0.1
    wv = jax.random.normal(keys[5], (C, C), dtype=jnp.float32) * 0.1
    bv = jax.random.normal(keys[6], (C,), dtype=jnp.float32) * 0.1
    # nn.Parameter(torch.zeros(1)) -> gamma starts at 0; use a nonzero value so
    # the attention path is numerically exercised.
    gamma = jnp.array([0.5], dtype=jnp.float32)

    out = jax.jit(pam_forward)(x, wq, bq, wk, bk, wv, bv, gamma)
    out = jax.block_until_ready(out)

    ref = pam_reference(x, wq, bq, wk, bk, wv, bv, gamma)
    assert out.shape == (B, C, H, W)
    # bf16 MXU inputs (f32 accumulation) + approx reciprocal -> ~1e-3-level
    # absolute error vs the f32 reference; compare with a matching tolerance.
    assert jnp.allclose(out, ref, atol=3e-2, rtol=3e-2), "mismatch vs reference"

    print("KERNEL_OK")
</pallas_src>

<mosaic_0001>
module attributes {stable_mosaic.version = 11 : i64} {
  func.func @pam_kernel(%arg0: i32, %arg1: i32, %arg2: i32, %arg3: memref<1x128x16xf32, #tpu.memory_space<vmem>>, %arg4: memref<1x128x16xf32, #tpu.memory_space<vmem>>, %arg5: memref<16x128xbf16, #tpu.memory_space<vmem>>, %arg6: memref<1x128xf32, #tpu.memory_space<vmem>>, %arg7: memref<16x128xbf16, #tpu.memory_space<vmem>>, %arg8: memref<1x128xf32, #tpu.memory_space<vmem>>, %arg9: memref<16x16xbf16, #tpu.memory_space<vmem>>, %arg10: memref<1x16xf32, #tpu.memory_space<vmem>>, %arg11: memref<1xf32, #tpu.memory_space<smem>>, %arg12: memref<1x128x16xf32, #tpu.memory_space<vmem>>, %arg13: memref<128x128xbf16, #tpu.memory_space<vmem>>, %arg14: memref<128x1xf32, #tpu.memory_space<vmem>>, %arg15: memref<128x1xf32, #tpu.memory_space<vmem>>, %arg16: memref<128x16xf32, #tpu.memory_space<vmem>>) attributes {dimension_semantics = [#tpu.dimension_semantics<parallel>, #tpu.dimension_semantics<parallel>, #tpu.dimension_semantics<arbitrary>], iteration_bounds = array<i64: 2, 2, 2>, scalar_prefetch = 0 : i64, scratch_operands = 4 : i64, tpu.core_type = #tpu.core_type<tc>, window_params = [{transform_indices = @transform_0, window_bounds = array<i64: 1, 128, 16>}, {transform_indices = @transform_1, window_bounds = array<i64: 1, 128, 16>}, {pipeline_mode = #tpu.pipeline_mode<synchronous>, transform_indices = @transform_2, window_bounds = array<i64: 16, 128>}, {pipeline_mode = #tpu.pipeline_mode<synchronous>, transform_indices = @transform_3, window_bounds = array<i64: 1, 128>}, {pipeline_mode = #tpu.pipeline_mode<synchronous>, transform_indices = @transform_4, window_bounds = array<i64: 16, 128>}, {pipeline_mode = #tpu.pipeline_mode<synchronous>, transform_indices = @transform_5, window_bounds = array<i64: 1, 128>}, {pipeline_mode = #tpu.pipeline_mode<synchronous>, transform_indices = @transform_6, window_bounds = array<i64: 16, 16>}, {pipeline_mode = #tpu.pipeline_mode<synchronous>, transform_indices = @transform_7, window_bounds = array<i64: 1, 16>}, {transform_indices = @transform_8, window_bounds = array<i64: 1>}, {transform_indices = @transform_9, window_bounds = array<i64: 1, 128, 16>}]} {
    %c0_i32 = arith.constant 0 : i32
    %0 = arith.cmpi eq, %arg2, %c0_i32 : i32
    %1 = arith.extui %0 : i1 to i32
    %c0_i32_0 = arith.constant 0 : i32
    %2 = arith.cmpi ne, %1, %c0_i32_0 : i32
    scf.if %2 {
      %cst_31 = arith.constant 0xFF800000 : f32
      %46 = vector.broadcast %cst_31 : f32 to vector<128x1xf32>
      %c0_32 = arith.constant 0 : index
      %c0_33 = arith.constant 0 : index
      %47 = vector.load %arg14[%c0_32, %c0_33] : memref<128x1xf32, #tpu.memory_space<vmem>>, vector<128x1xf32>
      tpu.vector_store %arg14[%c0_32, %c0_33], %46 {strides = array<i32>} : memref<128x1xf32, #tpu.memory_space<vmem>>, vector<128x1xf32>,
      %cst_34 = arith.constant 0.000000e+00 : f32
      %48 = vector.broadcast %cst_34 : f32 to vector<128x1xf32>
      %c0_35 = arith.constant 0 : index
      %c0_36 = arith.constant 0 : index
      %49 = vector.load %arg15[%c0_35, %c0_36] : memref<128x1xf32, #tpu.memory_space<vmem>>, vector<128x1xf32>
      tpu.vector_store %arg15[%c0_35, %c0_36], %48 {strides = array<i32>} : memref<128x1xf32, #tpu.memory_space<vmem>>, vector<128x1xf32>,
      %cst_37 = arith.constant 0.000000e+00 : f32
      %50 = vector.broadcast %cst_37 : f32 to vector<128x16xf32>
      %c0_38 = arith.constant 0 : index
      %c0_39 = arith.constant 0 : index
      %51 = vector.load %arg16[%c0_38, %c0_39] : memref<128x16xf32, #tpu.memory_space<vmem>>, vector<128x16xf32>
      tpu.vector_store %arg16[%c0_38, %c0_39], %50 {strides = array<i32>} : memref<128x16xf32, #tpu.memory_space<vmem>>, vector<128x16xf32>,
      %c0_40 = arith.constant 0 : index
      %c0_41 = arith.constant 0 : index
      %c0_42 = arith.constant 0 : index
      %52 = vector.load %arg3[%c0_40, %c0_41, %c0_42] : memref<1x128x16xf32, #tpu.memory_space<vmem>>, vector<1x128x16xf32>
      %53 = vector.shape_cast %52 : vector<1x128x16xf32> to vector<128x16xf32>
      %54 = arith.truncf %53 : vector<128x16xf32> to vector<128x16xbf16>
      %c0_43 = arith.constant 0 : index
      %c0_44 = arith.constant 0 : index
      %55 = vector.load %arg5[%c0_43, %c0_44] : memref<16x128xbf16, #tpu.memory_space<vmem>>, vector<16x128xbf16>
      %cst_45 = arith.constant dense<0.000000e+00> : vector<128x128xf32>
      %56 = tpu.matmul %54, %55, %cst_45 {dimension_numbers = #tpu.dot_dimension_numbers<[1], [0], [0], [1], [0, 0, 1, 1], [], []>} : vector<128x16xbf16>, vector<16x128xbf16>, vector<128x128xf32> -> vector<128x128xf32>
      %c0_46 = arith.constant 0 : index
      %c0_47 = arith.constant 0 : index
      %57 = vector.load %arg6[%c0_46, %c0_47] : memref<1x128xf32, #tpu.memory_space<vmem>>, vector<1x128xf32>
      %58 = vector.broadcast %57 : vector<1x128xf32> to vector<128x128xf32>
      %59 = arith.addf %56, %58 : vector<128x128xf32>
      %60 = arith.truncf %59 : vector<128x128xf32> to vector<128x128xbf16>
      %c0_48 = arith.constant 0 : index
      %c0_49 = arith.constant 0 : index
      %61 = vector.load %arg13[%c0_48, %c0_49] : memref<128x128xbf16, #tpu.memory_space<vmem>>, vector<128x128xbf16>
      tpu.vector_store %arg13[%c0_48, %c0_49], %60 {strides = array<i32>} : memref<128x128xbf16, #tpu.memory_space<vmem>>, vector<128x128xbf16>,
    } else {
    }
    %c0 = arith.constant 0 : index
    %c0_1 = arith.constant 0 : index
    %c0_2 = arith.constant 0 : index
    %3 = vector.load %arg4[%c0, %c0_1, %c0_2] : memref<1x128x16xf32, #tpu.memory_space<vmem>>, vector<1x128x16xf32>
    %4 = vector.shape_cast %3 : vector<1x128x16xf32> to vector<128x16xf32>
    %5 = arith.truncf %4 : vector<128x16xf32> to vector<128x16xbf16>
    %c0_3 = arith.constant 0 : index
    %c0_4 = arith.constant 0 : index
    %6 = vector.load %arg7[%c0_3, %c0_4] : memref<16x128xbf16, #tpu.memory_space<vmem>>, vector<16x128xbf16>
    %cst = arith.constant dense<0.000000e+00> : vector<128x128xf32>
    %7 = tpu.matmul %5, %6, %cst {dimension_numbers = #tpu.dot_dimension_numbers<[1], [0], [0], [1], [0, 0, 1, 1], [], []>} : vector<128x16xbf16>, vector<16x128xbf16>, vector<128x128xf32> -> vector<128x128xf32>
    %c0_5 = arith.constant 0 : index
    %c0_6 = arith.constant 0 : index
    %8 = vector.load %arg8[%c0_5, %c0_6] : memref<1x128xf32, #tpu.memory_space<vmem>>, vector<1x128xf32>
    %9 = vector.broadcast %8 : vector<1x128xf32> to vector<128x128xf32>
    %10 = arith.addf %7, %9 : vector<128x128xf32>
    %c0_7 = arith.constant 0 : index
    %c0_8 = arith.constant 0 : index
    %11 = vector.load %arg9[%c0_7, %c0_8] : memref<16x16xbf16, #tpu.memory_space<vmem>>, vector<16x16xbf16>
    %cst_9 = arith.constant dense<0.000000e+00> : vector<128x16xf32>
    %12 = tpu.matmul %5, %11, %cst_9 {dimension_numbers = #tpu.dot_dimension_numbers<[1], [0], [0], [1], [0, 0, 1, 1], [], []>} : vector<128x16xbf16>, vector<16x16xbf16>, vector<128x16xf32> -> vector<128x16xf32>
    %c0_10 = arith.constant 0 : index
    %c0_11 = arith.constant 0 : index
    %13 = vector.load %arg10[%c0_10, %c0_11] : memref<1x16xf32, #tpu.memory_space<vmem>>, vector<1x16xf32>
    %14 = vector.broadcast %13 : vector<1x16xf32> to vector<128x16xf32>
    %15 = arith.addf %12, %14 : vector<128x16xf32>
    %c0_12 = arith.constant 0 : index
    %c0_13 = arith.constant 0 : index
    %16 = vector.load %arg13[%c0_12, %c0_13] : memref<128x128xbf16, #tpu.memory_space<vmem>>, vector<128x128xbf16>
    %17 = arith.truncf %10 : vector<128x128xf32> to vector<128x128xbf16>
    %cst_14 = arith.constant dense<0.000000e+00> : vector<128x128xf32>
    %18 = tpu.matmul %16, %17, %cst_14 {dimension_numbers = #tpu.dot_dimension_numbers<[1], [1], [0], [0], [0, 0, 1, 0], [], []>} : vector<128x128xbf16>, vector<128x128xbf16>, vector<128x128xf32> -> vector<128x128xf32>
    %c0_15 = arith.constant 0 : index
    %c0_16 = arith.constant 0 : index
    %19 = vector.load %arg14[%c0_15, %c0_16] : memref<128x1xf32, #tpu.memory_space<vmem>>, vector<128x1xf32>
    %cst_17 = arith.constant dense<0xFF800000> : vector<128xf32>
    %20 = vector.multi_reduction <maximumf>, %18, %cst_17 [1] : vector<128x128xf32> to vector<128xf32>
    %21 = vector.shape_cast %20 : vector<128xf32> to vector<128x1xf32>
    %22 = arith.maximumf %19, %21 : vector<128x1xf32>
    %23 = arith.subf %19, %22 : vector<128x1xf32>
    %24 = math.exp %23 : vector<128x1xf32>
    %25 = vector.broadcast %22 : vector<128x1xf32> to vector<128x128xf32>
    %26 = arith.subf %18, %25 : vector<128x128xf32>
    %27 = math.exp %26 : vector<128x128xf32>
    %c0_18 = arith.constant 0 : index
    %c0_19 = arith.constant 0 : index
    %28 = vector.load %arg15[%c0_18, %c0_19] : memref<128x1xf32, #tpu.memory_space<vmem>>, vector<128x1xf32>
    %29 = arith.mulf %24, %28 : vector<128x1xf32>
    %cst_20 = arith.constant dense<0.000000e+00> : vector<128xf32>
    %30 = vector.multi_reduction <add>, %27, %cst_20 [1] : vector<128x128xf32> to vector<128xf32>
    %31 = vector.shape_cast %30 : vector<128xf32> to vector<128x1xf32>
    %32 = arith.addf %29, %31 : vector<128x1xf32>
    %c0_21 = arith.constant 0 : index
    %c0_22 = arith.constant 0 : index
    %33 = vector.load %arg15[%c0_21, %c0_22] : memref<128x1xf32, #tpu.memory_space<vmem>>, vector<128x1xf32>
    tpu.vector_store %arg15[%c0_21, %c0_22], %32 {strides = array<i32>} : memref<128x1xf32, #tpu.memory_space<vmem>>, vector<128x1xf32>,
    %c0_23 = arith.constant 0 : index
    %c0_24 = arith.constant 0 : index
    %34 = vector.load %arg16[%c0_23, %c0_24] : memref<128x16xf32, #tpu.memory_space<vmem>>, vector<128x16xf32>
    %35 = vector.broadcast %24 : vector<128x1xf32> to vector<128x16xf32>
    %36 = arith.mulf %35, %34 : vector<128x16xf32>
    %37 = arith.truncf %27 : vector<128x128xf32> to vector<128x128xbf16>
    %38 = arith.truncf %15 : vector<128x16xf32> to vector<128x16xbf16>
    %cst_25 = arith.constant dense<0.000000e+00> : vector<128x16xf32>
    %39 = tpu.matmul %37, %38, %cst_25 {dimension_numbers = #tpu.dot_dimension_numbers<[1], [0], [0], [1], [0, 0, 1, 1], [], []>} : vector<128x128xbf16>, vector<128x16xbf16>, vector<128x16xf32> -> vector<128x16xf32>
    %40 = arith.addf %36, %39 : vector<128x16xf32>
    %c0_26 = arith.constant 0 : index
    %c0_27 = arith.constant 0 : index
    %41 = vector.load %arg16[%c0_26, %c0_27] : memref<128x16xf32, #tpu.memory_space<vmem>>, vector<128x16xf32>
    tpu.vector_store %arg16[%c0_26, %c0_27], %40 {strides = array<i32>} : memref<128x16xf32, #tpu.memory_space<vmem>>, vector<128x16xf32>,
    %c0_28 = arith.constant 0 : index
    %c0_29 = arith.constant 0 : index
    %42 = vector.load %arg14[%c0_28, %c0_29] : memref<128x1xf32, #tpu.memory_space<vmem>>, vector<128x1xf32>
    tpu.vector_store %arg14[%c0_28, %c0_29], %22 {strides = array<i32>} : memref<128x1xf32, #tpu.memory_space<vmem>>, vector<128x1xf32>,
    %c1_i32 = arith.constant 1 : i32
    %43 = arith.cmpi eq, %arg2, %c1_i32 : i32
    %44 = arith.extui %43 : i1 to i32
    %c0_i32_30 = arith.constant 0 : i32
    %45 = arith.cmpi ne, %44, %c0_i32_30 : i32
    scf.if %45 {
      %c0_31 = arith.constant 0 : index
      %46 = memref.load %arg11[%c0_31] : memref<1xf32, #tpu.memory_space<smem>>
      %c0_32 = arith.constant 0 : index
      %c0_33 = arith.constant 0 : index
      %47 = vector.load %arg15[%c0_32, %c0_33] : memref<128x1xf32, #tpu.memory_space<vmem>>, vector<128x1xf32>
      %48 = tpu.reciprocal %47 {approx = true} : vector<128x1xf32> -> vector<128x1xf32>
      %c0_34 = arith.constant 0 : index
      %c0_35 = arith.constant 0 : index
      %49 = vector.load %arg16[%c0_34, %c0_35] : memref<128x16xf32, #tpu.memory_space<vmem>>, vector<128x16xf32>
      %50 = vector.broadcast %48 : vector<128x1xf32> to vector<128x16xf32>
      %51 = arith.mulf %49, %50 : vector<128x16xf32>
      %52 = vector.broadcast %46 : f32 to vector<128x16xf32>
      %53 = arith.mulf %52, %51 : vector<128x16xf32>
      %c0_36 = arith.constant 0 : index
      %c0_37 = arith.constant 0 : index
      %c0_38 = arith.constant 0 : index
      %54 = vector.load %arg3[%c0_36, %c0_37, %c0_38] : memref<1x128x16xf32, #tpu.memory_space<vmem>>, vector<1x128x16xf32>
      %55 = vector.shape_cast %54 : vector<1x128x16xf32> to vector<128x16xf32>
      %56 = arith.addf %53, %55 : vector<128x16xf32>
      %c0_39 = arith.constant 0 : index
      %c0_40 = arith.constant 0 : index
      %c0_41 = arith.constant 0 : index
      %57 = vector.load %arg12[%c0_39, %c0_40, %c0_41] : memref<1x128x16xf32, #tpu.memory_space<vmem>>, vector<1x128x16xf32>
      %58 = vector.shape_cast %57 : vector<1x128x16xf32> to vector<128x16xf32>
      %59 = vector.shape_cast %56 : vector<128x16xf32> to vector<1x128x16xf32>
      tpu.vector_store %arg12[%c0_39, %c0_40, %c0_41], %59 {strides = array<i32>} : memref<1x128x16xf32, #tpu.memory_space<vmem>>, vector<1x128x16xf32>,
    } else {
    }
    return
  }
  func.func @transform_0(%arg0: i32, %arg1: i32, %arg2: i32) -> (i32, i32, i32) {
    %c0_i32 = arith.constant 0 : i32
    %c0_i32_0 = arith.constant 0 : i32
    return %arg0, %arg1, %c0_i32 : i32, i32, i32
  }
  func.func @transform_1(%arg0: i32, %arg1: i32, %arg2: i32) -> (i32, i32, i32) {
    %c0_i32 = arith.constant 0 : i32
    %c0_i32_0 = arith.constant 0 : i32
    return %arg0, %arg2, %c0_i32 : i32, i32, i32
  }
  func.func @transform_2(%arg0: i32, %arg1: i32, %arg2: i32) -> (i32, i32) {
    %c0_i32 = arith.constant 0 : i32
    %c0_i32_0 = arith.constant 0 : i32
    %c0_i32_1 = arith.constant 0 : i32
    return %c0_i32, %c0_i32_0 : i32, i32
  }
  func.func @transform_3(%arg0: i32, %arg1: i32, %arg2: i32) -> (i32, i32) {
    %c0_i32 = arith.constant 0 : i32
    %c0_i32_0 = arith.constant 0 : i32
    %c0_i32_1 = arith.constant 0 : i32
    return %c0_i32, %c0_i32_0 : i32, i32
  }
  func.func @transform_4(%arg0: i32, %arg1: i32, %arg2: i32) -> (i32, i32) {
    %c0_i32 = arith.constant 0 : i32
    %c0_i32_0 = arith.constant 0 : i32
    %c0_i32_1 = arith.constant 0 : i32
    return %c0_i32, %c0_i32_0 : i32, i32
  }
  func.func @transform_5(%arg0: i32, %arg1: i32, %arg2: i32) -> (i32, i32) {
    %c0_i32 = arith.constant 0 : i32
    %c0_i32_0 = arith.constant 0 : i32
    %c0_i32_1 = arith.constant 0 : i32
    return %c0_i32, %c0_i32_0 : i32, i32
  }
  func.func @transform_6(%arg0: i32, %arg1: i32, %arg2: i32) -> (i32, i32) {
    %c0_i32 = arith.constant 0 : i32
    %c0_i32_0 = arith.constant 0 : i32
    %c0_i32_1 = arith.constant 0 : i32
    return %c0_i32, %c0_i32_0 : i32, i32
  }
  func.func @transform_7(%arg0: i32, %arg1: i32, %arg2: i32) -> (i32, i32) {
    %c0_i32 = arith.constant 0 : i32
    %c0_i32_0 = arith.constant 0 : i32
    %c0_i32_1 = arith.constant 0 : i32
    return %c0_i32, %c0_i32_0 : i32, i32
  }
  func.func @transform_8(%arg0: i32, %arg1: i32, %arg2: i32) -> i32 {
    %c0_i32 = arith.constant 0 : i32
    %c0_i32_0 = arith.constant 0 : i32
    return %c0_i32 : i32
  }
  func.func @transform_9(%arg0: i32, %arg1: i32, %arg2: i32) -> (i32, i32, i32) {
    %c0_i32 = arith.constant 0 : i32
    %c0_i32_0 = arith.constant 0 : i32
    return %arg0, %arg1, %c0_i32 : i32, i32, i32
  }
}

</mosaic_0001>

<bundles_post_ra>
// kernel: pam_forward.1
= control target key start
LH: loop header
LB: loop body
LE: loop exit
PB: predicated region body
PF: predicated region fallthrough
CT: control target
= control target key end

     0   :  { %s2689_s11 = smov 0   ;;  %s2691_s12 = smov 0   ;;  %s3281_s0 = inlined_call_operand.vmem [shape: f32[2,256,16], index: 0, kind: input, shape index: {}, may-alias: {0,1}]   ;;  %s3282_s1 = inlined_call_operand.vmem [shape: f32[2,256,16], index: 1, kind: input, shape index: {}, may-alias: {0,1}]   ;;  %s3283_s2 = inlined_call_operand.vmem [shape: bf16[16,128], index: 2, kind: input, shape index: {}]   ;;  %s3284_s3 = inlined_call_operand.vmem [shape: f32[1,128], index: 3, kind: input, shape index: {}]   ;;  %s3285_s4 = inlined_call_operand.vmem [shape: bf16[16,128], index: 4, kind: input, shape index: {}]   ;;  %s3286_s5 = inlined_call_operand.vmem [shape: f32[1,128], index: 5, kind: input, shape index: {}]   ;;  %s3287_s6 = inlined_call_operand.vmem [shape: bf16[16,16], index: 6, kind: input, shape index: {}]   ;;  %s3288_s7 = inlined_call_operand.vmem [shape: f32[1,16], index: 7, kind: input, shape index: {}]   ;;  %s3289_s8 = inlined_call_operand.<no memory space> [shape: f32[1], index: 8, kind: input, shape index: {}]   ;;  %s3290_s9 = inlined_call_operand.vmem [shape: f32[2,256,16], index: 9, kind: output, shape index: {}]  }
   0x1   :  { %14 = sst [smem:[#allocation6]] %s3289_s8  ;;  %s2693_s13 = smov 0  }
   0x2   :  { %s2695_s14 = smov 0   ;;  %s2697_s15 = smov 0  }
   0x3   :  { %s2699_s16 = smov 0   ;;  %s2701_s17 = smov 0  }
   0x4 LB: > { %s32_s8 = sadd.s32 1, %s2618_s14  ;;  %s35_s18 = sadd.s32 1, %s2622_s15  ;;  %s2630_s17 = sphi %s2701_s17, %s20_s17   ;;  %s2626_s16 = sphi %s2699_s16, %s3300_s16   ;;  %s2622_s15 = sphi %s2697_s15, %s3299_s15   ;;  %s2618_s14 = sphi %s2695_s14, %s3298_s14   ;;  %s2614_s13 = sphi %s2693_s13, %s3297_s13   ;;  %s2610_s12 = sphi %s2691_s12, %s3296_s12   ;;  %s2606_s11 = sphi %s2689_s11, %s3295_s11  }
   0x5   : > { %p33_p0 = scmp.ge.s32.totalorder %s32_s8, 2  ;;  %p2095_p1 = scmp.ge.s32.totalorder %s2630_s17, 1 }
   0x6   : > { %p333_p2 = scmp.lt.s32.totalorder %s2630_s17, 9  ;;  %s39_s19 = sadd.s32 1, %s2626_s16 }
   0x7   : > { %s3302_s8 = smov (%p33_p0, %s32_s8), 0  ;;  %s3304_s18 = smov (!%p33_p0, %s35_s18), %s2622_s15 }
   0x8   : > { %p334_p3 = pnand %p2095_p1, %p333_p2  ;;  %p37_p4 = scmp.ge.s32.totalorder %s3304_s18, 2 }
   0x9   : > { %s2096_s20 = sshll.u32 (!%p334_p3), %s2610_s12, 4  ;;  %p387_p6 = scmp.lt.s32.totalorder (!%p334_p3), %s2614_s13, 1 }
   0xa   : > { %s3306_s18 = smov (%p37_p4, %s3304_s18), 0  ;;  %s3308_s19 = smov (!%p37_p4, %s39_s19), %s2626_s16 }
   0xb   : > { %3291 = sst [smem:[#allocation7_spill]] %s3306_s18  ;;  %p41_p5 = scmp.ge.s32.totalorder %s3308_s19, 2 }
   0xc   : > { %337 = sbr.rel (%p334_p3) target bundleno = 1436 (0x59c), region = 56  ;;  %p389_p7 = scmp.lt.s32.totalorder (!%p334_p3), %s2096_s20, 31 }
   0xd   : > { %s3310_s19 = smov (%p41_p5, %s3308_s19), 0  ;;  %s2099_s21 = sshll.u32 (!%p334_p3), %s2606_s11, 4 }
   0xe   : > { %3292 = sst [smem:[#allocation8_spill]] %s3310_s19  ;;  %p399_p8 = scmp.lt.s32.totalorder (!%p334_p3), %s2099_s21, 31 }
   0xf   : > { %p2105_p9 = scmp.ne.s32.totalorder (!%p334_p3), %s2606_s11, 0 }
  0x11   : > { %s3312_s13 = smov (!%p387_p6, %s2614_s13), 1  ;;  %s3314_s20 = smov (!%p389_p7, %s2096_s20), 31 }
  0x12   : > { %s2097_s22 = sshll.u32 %s3312_s13, 5  ;;  %s3316_s21 = smov (!%p399_p8, %s2099_s21), 31 }
  0x13   : > { %s392_s23 = sadd.s32 %s2097_s22, %s3314_s20  ;;  %s402_s10 = sadd.s32 %s2097_s22, %s3316_s21 }
  0x14   : > { %s2098_s24 = sshll.u32 %s392_s23, 3  ;;  %s2101_s12 = sshll.u32 %s402_s10, 3 }
  0x15   : > { %s2737_s27 = scalar_lea.vmem %s3281_s0, %s2098_s24  ;;  %s2742_s30 = scalar_lea.vmem %s3290_s9, %s2098_s24 }
  0x16   : > { %s2747_s13 = scalar_lea.vmem %s3282_s1, %s2101_s12  ;;  %420 = sbr.rel (%p2105_p9) target bundleno = 246 (0xf6), region = 60 }
  0x1b   : > { %v2465_v0 = vld [vmem:[%s3283_s2] sm:$0xff]   ;;  %vm421_vm0 = vcmask 7168   ;;  %vm454_vm1 = vcmask 130048   ;;  %v2757_v2 = vld [vmem:[%s2737_s27 + $0x8] sm:$0xff]  ;;  %v2632_v4 = vmov -inf   ;;  %v2633_v5 = vmov 0.0  }
  0x1c   : > { %v2754_v1 = vld [vmem:[%s2737_s27] sm:$0xff]  ;;  %2285 = vmatprep.subr.bf16.mxu0 %v2465_v0  ;;  %2403 = vmatprep.subr.bf16.mxu1 %v2465_v0  ;;  %422 = vst.msk [vmem:[#allocation3] sm:$0xff] %vm421_vm0, %v2632_v4  ;;  %423 = vst.msk [vmem:[#allocation3 + $0x8] sm:$0xff] %vm421_vm0, %v2632_v4  ;;  %v480_v7 = vld [vmem:[%s2737_s27 + $0x48] sm:$0xff] }
  0x1d   : > { %v2760_v3 = vld [vmem:[%s2737_s27 + $0x40] sm:$0xff]  ;;  %424 = vst.msk [vmem:[#allocation3 + $0x10] sm:$0xff] %vm421_vm0, %v2632_v4  ;;  %425 = vst.msk [vmem:[#allocation3 + $0x18] sm:$0xff] %vm421_vm0, %v2632_v4  ;;  %v487_v6 = vpack.c.bf16 %v2757_v2, %v2754_v1  ;;  %v473_v8 = vld [vmem:[%s2737_s27 + $0x10] sm:$0xff]  ;;  %2286 = vmatpush3.bf16.msra.mxu0 %v2465_v0  ;;  %2404 = vmatpush3.bf16.msra.mxu1 %v2465_v0 }
  0x1e   : > { %426 = vst.msk [vmem:[#allocation3 + $0x20] sm:$0xff] %vm421_vm0, %v2632_v4  ;;  %427 = vst.msk [vmem:[#allocation3 + $0x28] sm:$0xff] %vm421_vm0, %v2632_v4  ;;  %v474_v9 = vld [vmem:[%s2737_s27 + $0x18] sm:$0xff]  ;;  %v491_v10 = vpack.c.bf16 %v480_v7, %v2760_v3  ;;  %v481_v12 = vld [vmem:[%s2737_s27 + $0x50] sm:$0xff] }
  0x1f   : > { %428 = vst.msk [vmem:[#allocation3 + $0x30] sm:$0xff] %vm421_vm0, %v2632_v4  ;;  %429 = vst.msk [vmem:[#allocation3 + $0x38] sm:$0xff] %vm421_vm0, %v2632_v4  ;;  %v488_v11 = vpack.c.bf16 %v474_v9, %v473_v8  ;;  %v482_v13 = vld [vmem:[%s2737_s27 + $0x58] sm:$0xff]  ;;  %v475_v14 = vld [vmem:[%s2737_s27 + $0x20] sm:$0xff]  ;;  %2287 = vmatprep.mubr.msk.bf16.mxu0 %vm454_vm1, %v487_v6 }
  0x20   : > { %430 = vst.msk [vmem:[#allocation3 + $0x40] sm:$0xff] %vm421_vm0, %v2632_v4  ;;  %431 = vst.msk [vmem:[#allocation3 + $0x48] sm:$0xff] %vm421_vm0, %v2632_v4  ;;  %v492_v15 = vpack.c.bf16 %v482_v13, %v481_v12  ;;  %v476_v16 = vld [vmem:[%s2737_s27 + $0x28] sm:$0xff]  ;;  %v483_v17 = vld [vmem:[%s2737_s27 + $0x60] sm:$0xff]  ;;  %2295 = vmatprep.mubr.msk.bf16.mxu1 %vm454_vm1, %v491_v10 }
  0x21   : > { %432 = vst.msk [vmem:[#allocation3 + $0x50] sm:$0xff] %vm421_vm0, %v2632_v4  ;;  %433 = vst.msk [vmem:[#allocation3 + $0x58] sm:$0xff] %vm421_vm0, %v2632_v4  ;;  %v484_v18 = vld [vmem:[%s2737_s27 + $0x68] sm:$0xff]  ;;  %v489_v19 = vpack.c.bf16 %v476_v16, %v475_v14  ;;  %2288 = vmatmul.mubr.msk.bf16.vlgmr.msra.gmra.mxu0 %vm454_vm1, %v488_v11  ;;  %v477_v21 = vld [vmem:[%s2737_s27 + $0x30] sm:$0xff] }
  0x22   : > { %434 = vst.msk [vmem:[#allocation3 + $0x60] sm:$0xff] %vm421_vm0, %v2632_v4  ;;  %435 = vst.msk [vmem:[#allocation3 + $0x68] sm:$0xff] %vm421_vm0, %v2632_v4  ;;  %v493_v20 = vpack.c.bf16 %v484_v18, %v483_v17  ;;  %2296 = vmatmul.mubr.msk.bf16.vlgmr.msra.gmra.mxu1 %vm454_vm1, %v492_v15  ;;  %v478_v22 = vld [vmem:[%s2737_s27 + $0x38] sm:$0xff]  ;;  %v485_v23 = vld [vmem:[%s2737_s27 + $0x70] sm:$0xff] }
  0x23   : > { %436 = vst.msk [vmem:[#allocation3 + $0x70] sm:$0xff] %vm421_vm0, %v2632_v4  ;;  %437 = vst.msk [vmem:[#allocation3 + $0x78] sm:$0xff] %vm421_vm0, %v2632_v4  ;;  %2291 = vmatprep.mubr.msk.bf16.mxu0 %vm454_vm1, %v489_v19  ;;  %v486_v24 = vld [vmem:[%s2737_s27 + $0x78] sm:$0xff]  ;;  %v490_v25 = vpack.c.bf16 %v478_v22, %v477_v21  ;;  %v2106_v29 = vld [vmem:[%s3284_s3] ss:$0 sm:$0xff] }
  0x24   : > { %438 = vst.msk [vmem:[#allocation4] sm:$0xff] %vm421_vm0, %v2633_v5  ;;  %439 = vst.msk [vmem:[#allocation4 + $0x8] sm:$0xff] %vm421_vm0, %v2633_v5  ;;  %2299 = vmatprep.mubr.msk.bf16.mxu1 %vm454_vm1, %v493_v20  ;;  %v494_v26 = vpack.c.bf16 %v486_v24, %v485_v23 }
  0x25   : > { %440 = vst.msk [vmem:[#allocation4 + $0x10] sm:$0xff] %vm421_vm0, %v2633_v5  ;;  %441 = vst.msk [vmem:[#allocation4 + $0x18] sm:$0xff] %vm421_vm0, %v2633_v5 }
  0x26   : > { %442 = vst.msk [vmem:[#allocation4 + $0x20] sm:$0xff] %vm421_vm0, %v2633_v5  ;;  %443 = vst.msk [vmem:[#allocation4 + $0x28] sm:$0xff] %vm421_vm0, %v2633_v5 }
  0x27   : > { %444 = vst.msk [vmem:[#allocation4 + $0x30] sm:$0xff] %vm421_vm0, %v2633_v5  ;;  %445 = vst.msk [vmem:[#allocation4 + $0x38] sm:$0xff] %vm421_vm0, %v2633_v5 }
  0x28   : > { %446 = vst.msk [vmem:[#allocation4 + $0x40] sm:$0xff] %vm421_vm0, %v2633_v5  ;;  %447 = vst.msk [vmem:[#allocation4 + $0x48] sm:$0xff] %vm421_vm0, %v2633_v5 }
  0x29   : > { %448 = vst.msk [vmem:[#allocation4 + $0x50] sm:$0xff] %vm421_vm0, %v2633_v5  ;;  %449 = vst.msk [vmem:[#allocation4 + $0x58] sm:$0xff] %vm421_vm0, %v2633_v5  ;;  %2292 = vmatmul.mubr.msk.bf16.gmra.mxu0 %vm454_vm1, %v490_v25 }
  0x2a   : > { %450 = vst.msk [vmem:[#allocation4 + $0x60] sm:$0xff] %vm421_vm0, %v2633_v5  ;;  %451 = vst.msk [vmem:[#allocation4 + $0x68] sm:$0xff] %vm421_vm0, %v2633_v5  ;;  %2300 = vmatmul.mubr.msk.bf16.gmra.mxu1 %vm454_vm1, %v494_v26 }
  0x2b   : > { %452 = vst.msk [vmem:[#allocation4 + $0x70] sm:$0xff] %vm421_vm0, %v2633_v5  ;;  %453 = vst.msk [vmem:[#allocation4 + $0x78] sm:$0xff] %vm421_vm0, %v2633_v5 }
  0x2c   : > { %455 = vst.msk [vmem:[#allocation5] sm:$0xff] %vm454_vm1, %v2633_v5  ;;  %456 = vst.msk [vmem:[#allocation5 + $0x8] sm:$0xff] %vm454_vm1, %v2633_v5 }
  0x2d   : > { %457 = vst.msk [vmem:[#allocation5 + $0x10] sm:$0xff] %vm454_vm1, %v2633_v5  ;;  %458 = vst.msk [vmem:[#allocation5 + $0x18] sm:$0xff] %vm454_vm1, %v2633_v5 }
  0x2e   : > { %459 = vst.msk [vmem:[#allocation5 + $0x20] sm:$0xff] %vm454_vm1, %v2633_v5  ;;  %460 = vst.msk [vmem:[#allocation5 + $0x28] sm:$0xff] %vm454_vm1, %v2633_v5 }
  0x2f   : > { %461 = vst.msk [vmem:[#allocation5 + $0x30] sm:$0xff] %vm454_vm1, %v2633_v5  ;;  %462 = vst.msk [vmem:[#allocation5 + $0x38] sm:$0xff] %vm454_vm1, %v2633_v5 }
  0x30   : > { %463 = vst.msk [vmem:[#allocation5 + $0x40] sm:$0xff] %vm454_vm1, %v2633_v5  ;;  %464 = vst.msk [vmem:[#allocation5 + $0x48] sm:$0xff] %vm454_vm1, %v2633_v5 }
  0x31   : > { %465 = vst.msk [vmem:[#allocation5 + $0x50] sm:$0xff] %vm454_vm1, %v2633_v5  ;;  %466 = vst.msk [vmem:[#allocation5 + $0x58] sm:$0xff] %vm454_vm1, %v2633_v5 }
  0x32   : > { %467 = vst.msk [vmem:[#allocation5 + $0x60] sm:$0xff] %vm454_vm1, %v2633_v5  ;;  %468 = vst.msk [vmem:[#allocation5 + $0x68] sm:$0xff] %vm454_vm1, %v2633_v5 }
  0x33   : > { %469 = vst.msk [vmem:[#allocation5 + $0x70] sm:$0xff] %vm454_vm1, %v2633_v5  ;;  %470 = vst.msk [vmem:[#allocation5 + $0x78] sm:$0xff] %vm454_vm1, %v2633_v5 }
  0xe1   : > { %v2289_v27 = vpop.f32.mrf.mxu0 }
  0xe2   : > { %v2297_v28 = vpop.f32.mrf.mxu1  ;;  %v577_v34 = vadd.f32 %v2289_v27, %v2106_v29 }
  0xe3   : > { %v568_v30 = vpop.f32.mrf.mxu0  ;;  %v609_v35 = vadd.f32 %v2297_v28, %v2106_v29 }
  0xe4   : > { %v600_v31 = vpop.f32.mrf.mxu1  ;;  %v569_v38 = vadd.f32 %v2106_v29, %v568_v30 }
  0xe5   : > { %v2290_v32 = vpop.f32.mrf.mxu0  ;;  %v601_v39 = vadd.f32 %v2106_v29, %v600_v31 }
  0xe6   : > { %v2298_v33 = vpop.f32.mrf.mxu1  ;;  %v580_v36 = vadd.f32 %v2290_v32, %v2106_v29 }
  0xe7   : > { %v612_v37 = vadd.f32 %v2298_v33, %v2106_v29  ;;  %v571_v40 = vpop.f32.mrf.mxu0 }
  0xe8   : > { %v603_v41 = vpop.f32.mrf.mxu1  ;;  %v2187_v42 = vpack.c.bf16 %v580_v36, %v577_v34  ;;  %v572_v44 = vadd.f32 %v2106_v29, %v571_v40 }
  0xe9   : > { %v2207_v43 = vpack.c.bf16 %v612_v37, %v609_v35  ;;  %v604_v45 = vadd.f32 %v2106_v29, %v603_v41  ;;  %v2293_v46 = vpop.f32.mrf.mxu0 }
  0xea   : > { %v2301_v47 = vpop.f32.mrf.mxu1  ;;  %2219 = vst [vmem:[#allocation2 + $0x8] sm:$0xff] %v2187_v42   ;;  %v2182_v48 = vpack.c.bf16 %v572_v44, %v569_v38  ;;  %v593_v54 = vadd.f32 %v2293_v46, %v2106_v29 }
  0xeb   : > { %2223 = vst [vmem:[#allocation2 + $0x28] sm:$0xff] %v2207_v43   ;;  %v2202_v49 = vpack.c.bf16 %v604_v45, %v601_v39  ;;  %v584_v50 = vpop.f32.mrf.mxu0  ;;  %v625_v55 = vadd.f32 %v2301_v47, %v2106_v29 }
  0xec   : > { %v616_v51 = vpop.f32.mrf.mxu1  ;;  %2183 = vst [vmem:[#allocation2] sm:$0xff] %v2182_v48   ;;  %v585_v58 = vadd.f32 %v2106_v29, %v584_v50 }
  0xed   : > { %2222 = vst [vmem:[#allocation2 + $0x20] sm:$0xff] %v2202_v49   ;;  %v2294_v52 = vpop.f32.mrf.mxu0  ;;  %v617_v59 = vadd.f32 %v2106_v29, %v616_v51 }
  0xee   : > { %v2302_v53 = vpop.f32.mrf.mxu1  ;;  %v596_v56 = vadd.f32 %v2294_v52, %v2106_v29 }
  0xef   : > { %v628_v57 = vadd.f32 %v2302_v53, %v2106_v29  ;;  %v587_v60 = vpop.f32.mrf.mxu0 }
  0xf0   : > { %v619_v61 = vpop.f32.mrf.mxu1  ;;  %v2197_v62 = vpack.c.bf16 %v596_v56, %v593_v54  ;;  %v588_v0 = vadd.f32 %v2106_v29, %v587_v60 }
  0xf1   : > { %v2217_v63 = vpack.c.bf16 %v628_v57, %v625_v55  ;;  %v620_v1 = vadd.f32 %v2106_v29, %v619_v61 }
  0xf2   : > { %2221 = vst [vmem:[#allocation2 + $0x18] sm:$0xff] %v2197_v62   ;;  %v2192_v2 = vpack.c.bf16 %v588_v0, %v585_v58 }
  0xf3   : > { %2225 = vst [vmem:[#allocation2 + $0x38] sm:$0xff] %v2217_v63   ;;  %v2212_v3 = vpack.c.bf16 %v620_v1, %v617_v59 }
  0xf4   : > { %2220 = vst [vmem:[#allocation2 + $0x10] sm:$0xff] %v2192_v2  }
  0xf5   : > { %2224 = vst [vmem:[#allocation2 + $0x30] sm:$0xff] %v2212_v3  }
  0xf6 PF: > { %v2468_v4 = vld [vmem:[%s3285_s4] sm:$0xff]   ;;  %v712_v6 = vld [vmem:[%s2747_s13 + $0x8] sm:$0xff]  ;;  %vm750_vm2 = vcmask 130048   ;;  %v713_v7 = vld [vmem:[%s2747_s13 + $0x10] sm:$0xff]  ;;  %vm1473_vm3 = vcmask 7168   ;;  %p2160_p10 = scmp.ne.s32.totalorder %s2606_s11, 1 }
  0xf7   : > { %v711_v5 = vld [vmem:[%s2747_s13] sm:$0xff]  ;;  %2303 = vmatprep.subr.bf16.mxu0 %v2468_v4  ;;  %v714_v9 = vld [vmem:[%s2747_s13 + $0x18] sm:$0xff]  ;;  %v716_v11 = vld [vmem:[%s2747_s13 + $0x28] sm:$0xff]  ;;  %s1767_s11 = sld [smem:[#allocation6]] (!%p2160_p10) }
  0xf8   : > { %v727_v8 = vpack.c.bf16 %v712_v6, %v711_v5  ;;  %v715_v10 = vld [vmem:[%s2747_s13 + $0x20] sm:$0xff]  ;;  %2304 = vmatpush3.bf16.msra.mxu0 %v2468_v4  ;;  %v728_v12 = vpack.c.bf16 %v714_v9, %v713_v7  ;;  %v717_v14 = vld [vmem:[%s2747_s13 + $0x30] sm:$0xff]  ;;  %v718_v15 = vld [vmem:[%s2747_s13 + $0x38] sm:$0xff] }
  0xf9   : > { %v729_v13 = vpack.c.bf16 %v716_v11, %v715_v10  ;;  %v719_v16 = vld [vmem:[%s2747_s13 + $0x40] sm:$0xff]  ;;  %v720_v17 = vld [vmem:[%s2747_s13 + $0x48] sm:$0xff]  ;;  %v730_v18 = vpack.c.bf16 %v718_v15, %v717_v14  ;;  %v721_v20 = vld [vmem:[%s2747_s13 + $0x50] sm:$0xff] }
  0xfa   : > { %2305 = vmatprep.mubr.msk.bf16.mxu0 %vm750_vm2, %v727_v8  ;;  %2323 = vmatprep.mubr.msk.bf16.mxu1 %vm750_vm2, %v727_v8  ;;  %v731_v19 = vpack.c.bf16 %v720_v17, %v719_v16  ;;  %v722_v21 = vld [vmem:[%s2747_s13 + $0x58] sm:$0xff]  ;;  %v723_v22 = vld [vmem:[%s2747_s13 + $0x60] sm:$0xff]  ;;  %v724_v23 = vld [vmem:[%s2747_s13 + $0x68] sm:$0xff] }
  0xfb   : > { %2306 = vmatmul.mubr.msk.bf16.vlgmr.msra.gmra.mxu0 %vm750_vm2, %v728_v12  ;;  %v732_v24 = vpack.c.bf16 %v722_v21, %v721_v20  ;;  %v733_v25 = vpack.c.bf16 %v724_v23, %v723_v22  ;;  %v725_v26 = vld [vmem:[%s2747_s13 + $0x70] sm:$0xff]  ;;  %v726_v27 = vld [vmem:[%s2747_s13 + $0x78] sm:$0xff]  ;;  %v2469_v29 = vld [vmem:[#allocation2] sm:$0xff]   ;;  %v2634_v22 = vmov 0  }
  0xfc   : > { %2309 = vmatprep.mubr.msk.bf16.mxu0 %vm750_vm2, %v729_v13  ;;  %v734_v28 = vpack.c.bf16 %v726_v27, %v725_v26  ;;  %v2477_v30 = vld [vmem:[%s3287_s6] sm:$0xff]   ;;  %v2470_v8 = vld [vmem:[#allocation2 + $0x8] sm:$0xff]   ;;  %v2471_v9 = vld [vmem:[#allocation2 + $0x10] sm:$0xff]   ;;  %2467 = vset.pattern.permute.xlu1 %v2634_v22 }
  0xfd   : > { %2321 = vmatprep.subr.bf16.mxu1 %v2477_v30  ;;  %v2132_v32 = vld [vmem:[%s3286_s5] ss:$0 sm:$0xff]  ;;  %v2472_v10 = vld [vmem:[#allocation2 + $0x18] sm:$0xff]   ;;  %2466 = vset.pattern.permute.xlu0 %v2634_v22 }
  0xfe   : > { %2322 = vmatpush3.bf16.msra.mxu1 %v2477_v30  ;;  %v2473_v11 = vld [vmem:[#allocation2 + $0x20] sm:$0xff]   ;;  %v2476_v14 = vld [vmem:[#allocation2 + $0x38] sm:$0xff]  }
 0x101   : > { %2324 = vmatmul.mubr.msk.bf16.vlgmr.msra.gmra.mxu1 %vm750_vm2, %v728_v12  ;;  %v2474_v12 = vld [vmem:[#allocation2 + $0x28] sm:$0xff]  }
 0x102   : > { %2327 = vmatprep.mubr.msk.bf16.mxu1 %vm750_vm2, %v729_v13  ;;  %v2475_v13 = vld [vmem:[#allocation2 + $0x30] sm:$0xff]  }
 0x103   : > { %2310 = vmatmul.mubr.msk.bf16.gmra.mxu0 %vm750_vm2, %v730_v18 }
 0x104   : > { %2313 = vmatprep.mubr.msk.bf16.mxu0 %vm750_vm2, %v731_v19 }
 0x109   : > { %2328 = vmatmul.mubr.msk.bf16.gmra.mxu1 %vm750_vm2, %v730_v18 }
 0x10a   : > { %2331 = vmatprep.mubr.msk.bf16.mxu1 %vm750_vm2, %v731_v19 }
 0x10b   : > { %2314 = vmatmul.mubr.msk.bf16.gmra.mxu0 %vm750_vm2, %v732_v24 }
 0x10c   : > { %2317 = vmatprep.mubr.msk.bf16.mxu0 %vm750_vm2, %v733_v25 }
 0x111   : > { %2332 = vmatmul.mubr.msk.bf16.gmra.mxu1 %vm750_vm2, %v732_v24 }
 0x112   : > { %2335 = vmatprep.mubr.msk.bf16.mxu1 %vm750_vm2, %v733_v25 }
 0x113   : > { %2318 = vmatmul.mubr.msk.bf16.gmra.mxu0 %vm750_vm2, %v734_v28 }
 0x114   : > { %2355 = vmatprep.mubr.bf16.mxu0 %v2469_v29 }
 0x119   : > { %2336 = vmatmul.mubr.msk.bf16.gmra.mxu1 %vm750_vm2, %v734_v28 }
 0x1bb   : > { %v2307_v31 = vpop.f32.mrf.mxu0 }
 0x1bc   : > { %v818_v35 = vadd.f32 %v2307_v31, %v2132_v32 }
 0x1bd   : > { %v809_v33 = vpop.f32.mrf.mxu0 }
 0x1be   : > { %v810_v38 = vadd.f32 %v2132_v32, %v809_v33 }
 0x1bf   : > { %v2308_v34 = vpop.f32.mrf.mxu0 }
 0x1c0   : > { %v821_v36 = vadd.f32 %v2308_v34, %v2132_v32 }
 0x1c1   : > { %v812_v37 = vpop.f32.mrf.mxu0 }
 0x1c2   : > { %v1001_v39 = vpack.c.bf16 %v821_v36, %v818_v35  ;;  %v813_v40 = vadd.f32 %v2132_v32, %v812_v37 }
 0x1c3   : > { %v2311_v41 = vpop.f32.mrf.mxu0 }
 0x1c4   : > { %v1000_v42 = vpack.c.bf16 %v813_v40, %v810_v38  ;;  %v834_v3 = vadd.f32 %v2311_v41, %v2132_v32 }
 0x1c5   : > { %v825_v43 = vpop.f32.mrf.mxu0 }
 0x1c6   : > { %v826_v6 = vadd.f32 %v2132_v32, %v825_v43 }
 0x1c7   : > { %v2312_v44 = vpop.f32.mrf.mxu0 }
 0x1c8   : > { %v837_v2 = vadd.f32 %v2312_v44, %v2132_v32  ;;  %v2142_v44 = vld [vmem:[%s3288_s7] ss:$0 sm:$0xff] }
 0x1c9   : > { %v828_v45 = vpop.f32.mrf.mxu0 }
 0x1ca   : > { %v1003_v4 = vpack.c.bf16 %v837_v2, %v834_v3  ;;  %v829_v5 = vadd.f32 %v2132_v32, %v828_v45 }
 0x1cb   : > { %v2315_v46 = vpop.f32.mrf.mxu0 }
 0x1cc   : > { %v850_v61 = vadd.f32 %v2315_v46, %v2132_v32  ;;  %v1002_v7 = vpack.c.bf16 %v829_v5, %v826_v6 }
 0x1cd   : > { %v841_v47 = vpop.f32.mrf.mxu0 }
 0x1ce   : > { %v842_v0 = vadd.f32 %v2132_v32, %v841_v47 }
 0x1cf   : > { %v2316_v48 = vpop.f32.mrf.mxu0 }
 0x1d0   : > { %v853_v60 = vadd.f32 %v2316_v48, %v2132_v32 }
 0x1d1   : > { %v844_v49 = vpop.f32.mrf.mxu0 }
 0x1d2   : > { %v1005_v62 = vpack.c.bf16 %v853_v60, %v850_v61  ;;  %v845_v63 = vadd.f32 %v2132_v32, %v844_v49 }
 0x1d3   : > { %v2319_v50 = vpop.f32.mrf.mxu0 }
 0x1d4   : > { %v866_v53 = vadd.f32 %v2319_v50, %v2132_v32  ;;  %v1004_v1 = vpack.c.bf16 %v845_v63, %v842_v0 }
 0x1d5   : > { %v857_v51 = vpop.f32.mrf.mxu0 }
 0x1d6   : > { %v858_v56 = vadd.f32 %v2132_v32, %v857_v51 }
 0x1d7   : > { %v2320_v52 = vpop.f32.mrf.mxu0 }
 0x1d8   : > { %v869_v54 = vadd.f32 %v2320_v52, %v2132_v32 }
 0x1d9   : > { %v860_v55 = vpop.f32.mrf.mxu0 }
 0x1da   : > { %v1007_v57 = vpack.c.bf16 %v869_v54, %v866_v53  ;;  %v861_v58 = vadd.f32 %v2132_v32, %v860_v55  ;;  %v2325_v32 = vpop.f32.mrf.mxu1 }
 0x1db   : > { %v930_v2 = vadd.f32 %v2325_v32, %v2142_v44 }
 0x1dc   : > { %v1006_v59 = vpack.c.bf16 %v861_v58, %v858_v56  ;;  %2339 = vmatprep.subr.bf16.mxu0 %v1007_v57  ;;  %v921_v33 = vpop.f32.mrf.mxu1 }
 0x1dd   : > { %2340 = vmatpush3.bf16.xpose.msra.mxu0 %v1007_v57  ;;  %v922_v5 = vadd.f32 %v2142_v44, %v921_v33  ;;  %v2937_v33 = vld [vmem:[#allocation3 + $0x8] sm:$0xff] }
 0x1de   : > { %2341 = vmatprep.subr.bf16.mxu0 %v1006_v59  ;;  %v2326_v34 = vpop.f32.mrf.mxu1 }
 0x1df   : > { %v933_v3 = vadd.f32 %v2326_v34, %v2142_v44 }
 0x1e0   : > { %v924_v35 = vpop.f32.mrf.mxu1 }
 0x1e1   : > { %v1611_v6 = vpack.c.bf16 %v933_v3, %v930_v2  ;;  %v2987_v2 = vld [vmem:[#allocation3 + $0x78] sm:$0xff] }
 0x1e2   : > { %v2329_v36 = vpop.f32.mrf.mxu1 }
 0x1e3   : > { %v946_v60 = vadd.f32 %v2329_v36, %v2142_v44 }
 0x1e4   : > { %v937_v37 = vpop.f32.mrf.mxu1 }
 0x1e5   : > { %2342 = vmatpush3.bf16.xpose.msra.mxu0 %v1006_v59  ;;  %v938_v63 = vadd.f32 %v2142_v44, %v937_v37  ;;  %v2942_v37 = vld [vmem:[#allocation3 + $0x20] sm:$0xff] }
 0x1e6   : > { %2343 = vmatprep.subr.bf16.mxu0 %v1005_v62  ;;  %v2330_v38 = vpop.f32.mrf.mxu1 }
 0x1e7   : > { %v949_v61 = vadd.f32 %v2330_v38, %v2142_v44 }
 0x1e9   : > { %v1613_v0 = vpack.c.bf16 %v949_v61, %v946_v60 }
 0x1ed   : > { %2344 = vmatpush3.bf16.xpose.msra.mxu0 %v1005_v62 }
 0x1ee   : > { %2345 = vmatprep.subr.bf16.mxu0 %v1004_v1 }
 0x1f5   : > { %2346 = vmatpush3.bf16.xpose.msra.mxu0 %v1004_v1 }
 0x1f6   : > { %2347 = vmatprep.subr.bf16.mxu0 %v1003_v4 }
 0x1fd   : > { %2348 = vmatpush3.bf16.xpose.msra.mxu0 %v1003_v4 }
 0x1fe   : > { %2349 = vmatprep.subr.bf16.mxu0 %v1002_v7 }
 0x205   : > { %2350 = vmatpush3.bf16.xpose.msra.mxu0 %v1002_v7  ;;  %v925_v7 = vadd.f32 %v2142_v44, %v924_v35 }
 0x206   : > { %2351 = vmatprep.subr.bf16.mxu0 %v1001_v39 }
 0x20d   : > { %2352 = vmatpush3.bf16.xpose.msra.mxu0 %v1001_v39  ;;  %v940_v39 = vpop.f32.mrf.mxu1 }
 0x20e   : > { %2353 = vmatprep.subr.bf16.mxu0 %v1000_v42  ;;  %v941_v1 = vadd.f32 %v2142_v44, %v940_v39  ;;  %v1160_v39 = vld [vmem:[#allocation3 + $0x38] sm:$0xff] }
 0x20f   : > { %v2333_v40 = vpop.f32.mrf.mxu1 }
 0x210   : > { %v962_v50 = vadd.f32 %v2333_v40, %v2142_v44  ;;  %v1612_v4 = vpack.c.bf16 %v941_v1, %v938_v63 }
 0x211   : > { %v953_v41 = vpop.f32.mrf.mxu1 }
 0x212   : > { %v954_v56 = vadd.f32 %v2142_v44, %v953_v41 }
 0x215   : > { %2354 = vmatpush3.bf16.xpose.msra.mxu0 %v1000_v42  ;;  %v2334_v42 = vpop.f32.mrf.mxu1 }
 0x216   : > { %v965_v51 = vadd.f32 %v2334_v42, %v2142_v44  ;;  %v2948_v42 = vld [vmem:[#allocation3 + $0x30] sm:$0xff] }
 0x217   : > { %v956_v43 = vpop.f32.mrf.mxu1 }
 0x218   : > { %v1615_v57 = vpack.c.bf16 %v965_v51, %v962_v50  ;;  %v957_v58 = vadd.f32 %v2142_v44, %v956_v43  ;;  %v2964_v51 = vld [vmem:[#allocation3 + $0x58] sm:$0xff] }
 0x219   : > { %v2337_v45 = vpop.f32.mrf.mxu1 }
 0x21a   : > { %v978_v47 = vadd.f32 %v2337_v45, %v2142_v44  ;;  %v1614_v62 = vpack.c.bf16 %v957_v58, %v954_v56  ;;  %v2952_v45 = vld [vmem:[#allocation3 + $0x28] sm:$0xff] }
 0x21b   : > { %v969_v46 = vpop.f32.mrf.mxu1  ;;  %v2976_v58 = vld [vmem:[#allocation3 + $0x48] sm:$0xff] }
 0x21c   : > { %2356 = vmatmul.mubr.bf16.vlgmr.msra.gmra.mxu0 %v2470_v8  ;;  %v970_v52 = vadd.f32 %v2142_v44, %v969_v46  ;;  %v1610_v8 = vpack.c.bf16 %v925_v7, %v922_v5  ;;  %v2994_v7 = vld [vmem:[#allocation3 + $0x70] sm:$0xff] }
 0x21d   : > { %2359 = vmatprep.mubr.bf16.mxu0 %v2471_v9  ;;  %v2338_v48 = vpop.f32.mrf.mxu1  ;;  %v2929_v9 = vld [vmem:[#allocation3 + $0x10] sm:$0xff] }
 0x21e   : > { %v981_v49 = vadd.f32 %v2338_v48, %v2142_v44  ;;  %v2958_v48 = vld [vmem:[#allocation3 + $0x40] sm:$0xff] }
 0x21f   : > { %v972_v54 = vpop.f32.mrf.mxu1 }
 0x220   : > { %v1617_v53 = vpack.c.bf16 %v981_v49, %v978_v47  ;;  %v973_v55 = vadd.f32 %v2142_v44, %v972_v54  ;;  %v2970_v54 = vld [vmem:[#allocation3 + $0x50] sm:$0xff] }
 0x222   : > { %2371 = vmatprep.subr.bf16.mxu1 %v1617_v53  ;;  %v1616_v59 = vpack.c.bf16 %v973_v55, %v970_v52 }
 0x223   : > { %2372 = vmatpush3.bf16.msra.mxu1 %v1617_v53 }
 0x224   : > { %2360 = vmatmul.mubr.bf16.gmra.mxu0 %v2472_v10  ;;  %2373 = vmatprep.subr.bf16.mxu1 %v1616_v59 }
 0x225   : > { %2363 = vmatprep.mubr.bf16.mxu0 %v2473_v11  ;;  %v1153_v11 = vld [vmem:[#allocation3] sm:$0xff] }
 0x227   : > { %2374 = vmatpush3.bf16.msra.mxu1 %v1616_v59 }
 0x228   : > { %2375 = vmatprep.subr.bf16.mxu1 %v1615_v57 }
 0x22b   : > { %2376 = vmatpush3.bf16.msra.mxu1 %v1615_v57 }
 0x22c   : > { %2364 = vmatmul.mubr.bf16.gmra.mxu0 %v2474_v12  ;;  %2377 = vmatprep.subr.bf16.mxu1 %v1614_v62 }
 0x22d   : > { %2367 = vmatprep.mubr.bf16.mxu0 %v2475_v13 }
 0x22f   : > { %2378 = vmatpush3.bf16.msra.mxu1 %v1614_v62  ;;  %v2982_v62 = vld [vmem:[#allocation3 + $0x60] sm:$0xff] }
 0x230   : > { %2379 = vmatprep.subr.bf16.mxu1 %v1613_v0 }
 0x233   : > { %2380 = vmatpush3.bf16.msra.mxu1 %v1613_v0 }
 0x234   : > { %2368 = vmatmul.mubr.bf16.gmra.mxu0 %v2476_v14  ;;  %2381 = vmatprep.subr.bf16.mxu1 %v1612_v4  ;;  %v1156_v14 = vld [vmem:[#allocation3 + $0x18] sm:$0xff] }
 0x237   : > { %2382 = vmatpush3.bf16.msra.mxu1 %v1612_v4 }
 0x238   : > { %2383 = vmatprep.subr.bf16.mxu1 %v1611_v6 }
 0x23b   : > { %2384 = vmatpush3.bf16.msra.mxu1 %v1611_v6 }
 0x23c   : > { %2385 = vmatprep.subr.bf16.mxu1 %v1610_v8 }
 0x23f   : > { %2386 = vmatpush3.bf16.msra.mxu1 %v1610_v8 }
 0x2dc   : > { %v2878_v15 = vpop.f32.mrf.mxu0 }
 0x2dd   : > { %1173 = vmax.xlane.f32.xlu1 %v2878_v15 }
 0x2de   : > { %v2881_v16 = vpop.f32.mrf.mxu0 }
 0x2df   : > { %1169 = vmax.xlane.f32.xlu0 %v2881_v16 }
 0x2e0   : > { %v2884_v17 = vpop.f32.mrf.mxu0 }
 0x2e1   : > { %1175 = vmax.xlane.f32.xlu1 %v2884_v17 }
 0x2e2   : > { %v2887_v18 = vpop.f32.mrf.mxu0 }
 0x2e3   : > { %1171 = vmax.xlane.f32.xlu0 %v2887_v18 }
 0x2e4   : > { %v2890_v19 = vpop.f32.mrf.mxu0 }
 0x2e6   : > { %v2892_v20 = vpop.f32.mrf.mxu0 }
 0x2e7   : > { %1177 = vmax.xlane.f32.xlu0 %v2892_v20 }
 0x2e8   : > { %v2895_v21 = vpop.f32.mrf.mxu0 }
 0x2e9   : > { %1183 = vmax.xlane.f32.xlu1 %v2895_v21 }
 0x2ea   : > { %v2898_v23 = vpop.f32.mrf.mxu0 }
 0x2eb   : > { %1181 = vmax.xlane.f32.xlu0 %v2890_v19 }
 0x2ec   : > { %v2901_v24 = vpop.f32.mrf.mxu0 }
 0x2ed   : > { %1179 = vmax.xlane.f32.xlu1 %v2898_v23 }
 0x2ee   : > { %v2904_v25 = vpop.f32.mrf.mxu0 }
 0x2ef   : > { %1185 = vmax.xlane.f32.xlu0 %v2904_v25 }
 0x2f0   : > { %v2907_v26 = vpop.f32.mrf.mxu0 }
 0x2f1   : > { %1191 = vmax.xlane.f32.xlu1 %v2907_v26 }
 0x2f2   : > { %v2910_v27 = vpop.f32.mrf.mxu0 }
 0x2f3   : > { %1189 = vmax.xlane.f32.xlu0 %v2901_v24 }
 0x2f4   : > { %v2913_v28 = vpop.f32.mrf.mxu0 }
 0x2f5   : > { %1187 = vmax.xlane.f32.xlu1 %v2910_v27 }
 0x2f6   : > { %v2916_v29 = vpop.f32.mrf.mxu0 }
 0x2f7   : > { %1193 = vmax.xlane.f32.xlu0 %v2916_v29 }
 0x2f8   : > { %v2919_v30 = vpop.f32.mrf.mxu0 }
 0x2f9   : > { %1199 = vmax.xlane.f32.xlu1 %v2919_v30 }
 0x2fa   : > { %v2923_v31 = vpop.f32.mrf.mxu0 }
 0x2fb   : > { %1197 = vmax.xlane.f32.xlu0 %v2913_v28 }
 0x2fd   : > { %1195 = vmax.xlane.f32.xlu1 %v2923_v31 }
 0x366   : > { %v1174_v10 = vpop.xlane.xlu1 %1173 }
 0x367   : > { %v2932_v12 = vmax.f32 %v2929_v9, %v1174_v10 }
 0x368   : > { %v1170_v13 = vpop.xlane.xlu0 %1169 }
 0x369   : > { %1749 = vst.msk [vmem:[#allocation3 + $0x10] sm:$0xff] %vm1473_vm3, %v2932_v12  ;;  %v1201_v22 = vmax.f32 %v1153_v11, %v1170_v13  ;;  %1277 = vperm.xlu1 %2467, %v2932_v12   ;;  %v1166_v13 = vld [vmem:[#allocation3 + $0x68] sm:$0xff] }
 0x36a   : > { %v1176_v32 = vpop.xlane.xlu1 %1175 }
 0x36b   : > { %1747 = vst.msk [vmem:[#allocation3] sm:$0xff] %vm1473_vm3, %v1201_v22  ;;  %v1204_v34 = vmax.f32 %v1156_v14, %v1176_v32  ;;  %1267 = vperm.xlu0 %2466, %v1201_v22   ;;  %v1217_v55 = vsub.f32 %v1153_v11, %v1201_v22 }
 0x36c   : > { %v1172_v35 = vpop.xlane.xlu0 %1171 }
 0x36d   : > { %1750 = vst.msk [vmem:[#allocation3 + $0x18] sm:$0xff] %vm1473_vm3, %v1204_v34  ;;  %v1202_v36 = vmax.f32 %v2937_v33, %v1172_v35  ;;  %1282 = vperm.xlu1 %2467, %v1204_v34   ;;  %v1220_v60 = vsub.f32 %v1156_v14, %v1204_v34  ;;  %v1233_v63 = vmul.f32 1.442695, %v1217_v55  ;;  %v1219_v14 = vsub.f32 %v2929_v9, %v2932_v12 }
 0x36f   : > { %1748 = vst.msk [vmem:[#allocation3 + $0x8] sm:$0xff] %vm1473_vm3, %v1202_v36  ;;  %v1218_v3 = vsub.f32 %v2937_v33, %v1202_v36  ;;  %v1239_v5 = vmul.f32 1.442695, %v1220_v60  ;;  %2478 = vpow2.f32 %v1233_v63  ;;  %v1237_v12 = vmul.f32 1.442695, %v1219_v14 }
 0x370   : > { %v1178_v38 = vpop.xlane.xlu0 %1177 }
 0x371   : > { %v2946_v40 = vmax.f32 %v2942_v37, %v1178_v38  ;;  %1272 = vperm.xlu1 %2467, %v1202_v36   ;;  %v1235_v22 = vmul.f32 1.442695, %v1218_v3  ;;  %2480 = vpow2.f32 %v1239_v5 }
 0x372   : > { %v1184_v41 = vpop.xlane.xlu1 %1183 }
 0x373   : > { %1751 = vst.msk [vmem:[#allocation3 + $0x20] sm:$0xff] %vm1473_vm3, %v2946_v40  ;;  %v1208_v43 = vmax.f32 %v1160_v39, %v1184_v41  ;;  %2482 = vpow2.f32 %v1235_v22 }
 0x374   : > { %v1182_v44 = vpop.xlane.xlu0 %1181 }
 0x375   : > { %1754 = vst.msk [vmem:[#allocation3 + $0x38] sm:$0xff] %vm1473_vm3, %v1208_v43  ;;  %v2956_v46 = vmax.f32 %v2948_v42, %v1182_v44  ;;  %v1224_v8 = vsub.f32 %v1160_v39, %v1208_v43  ;;  %v1221_v39 = vsub.f32 %v2942_v37, %v2946_v40 }
 0x376   : > { %v1180_v47 = vpop.xlane.xlu1 %1179 }
 0x377   : > { %1753 = vst.msk [vmem:[#allocation3 + $0x30] sm:$0xff] %vm1473_vm3, %v2956_v46  ;;  %v1206_v49 = vmax.f32 %v2952_v45, %v1180_v47  ;;  %1297 = vperm.xlu1 %2467, %v2956_v46   ;;  %v1247_v35 = vmul.f32 1.442695, %v1224_v8  ;;  %v1241_v44 = vmul.f32 1.442695, %v1221_v39 }
 0x378   : > { %v1186_v50 = vpop.xlane.xlu0 %1185 }
 0x379   : > { %1752 = vst.msk [vmem:[#allocation3 + $0x28] sm:$0xff] %vm1473_vm3, %v1206_v49  ;;  %v2968_v52 = vmax.f32 %v2958_v48, %v1186_v50  ;;  %v1222_v36 = vsub.f32 %v2952_v45, %v1206_v49  ;;  %2484 = vpow2.f32 %v1247_v35  ;;  %v1223_v45 = vsub.f32 %v2948_v42, %v2956_v46 }
 0x37a   : > { %v1192_v53 = vpop.xlane.xlu1 %1191  ;;  %2486 = vpow2.f32 %v1237_v12 }
 0x37b   : > { %1755 = vst.msk [vmem:[#allocation3 + $0x40] sm:$0xff] %vm1473_vm3, %v2968_v52  ;;  %v1212_v56 = vmax.f32 %v2964_v51, %v1192_v53  ;;  %1287 = vperm.xlu1 %2467, %v2946_v40   ;;  %v1243_v41 = vmul.f32 1.442695, %v1222_v36  ;;  %v1225_v53 = vsub.f32 %v2958_v48, %v2968_v52 }
 0x37c   : > { %v1190_v57 = vpop.xlane.xlu0 %1189  ;;  %v3026_v40 = vpop.eup %2478 }
 0x37d   : > { %1758 = vst.msk [vmem:[#allocation3 + $0x58] sm:$0xff] %vm1473_vm3, %v1212_v56  ;;  %v2980_v59 = vmax.f32 %v2970_v54, %v1190_v57  ;;  %2488 = vpow2.f32 %v1243_v41 }
 0x37e   : > { %v1188_v61 = vpop.xlane.xlu1 %1187  ;;  %2490 = vpow2.f32 %v1241_v44 }
 0x37f   : > { %1757 = vst.msk [vmem:[#allocation3 + $0x50] sm:$0xff] %vm1473_vm3, %v2980_v59  ;;  %v1210_v0 = vmax.f32 %v2976_v58, %v1188_v61  ;;  %1292 = vperm.xlu1 %2467, %v1206_v49   ;;  %v1245_v49 = vmul.f32 1.442695, %v1223_v45  ;;  %v1227_v50 = vsub.f32 %v2970_v54, %v2980_v59 }
 0x380   : > { %v1194_v1 = vpop.xlane.xlu0 %1193 }
 0x381   : > { %1756 = vst.msk [vmem:[#allocation3 + $0x48] sm:$0xff] %vm1473_vm3, %v1210_v0  ;;  %v2992_v4 = vmax.f32 %v2982_v62, %v1194_v1  ;;  %1312 = vperm.xlu0 %2466, %v1210_v0   ;;  %v1226_v37 = vsub.f32 %v2976_v58, %v1210_v0  ;;  %v1253_v55 = vmul.f32 1.442695, %v1227_v50  ;;  %v1249_v58 = vmul.f32 1.442695, %v1225_v53 }
 0x382   : > { %v1200_v6 = vpop.xlane.xlu1 %1199 }
 0x383   : > { %1759 = vst.msk [vmem:[#allocation3 + $0x60] sm:$0xff] %vm1473_vm3, %v2992_v4  ;;  %v2999_v10 = vmax.f32 %v2987_v2, %v1200_v6  ;;  %1302 = vperm.xlu1 %2467, %v1208_v43   ;;  %v1228_v43 = vsub.f32 %v2964_v51, %v1212_v56  ;;  %v3031_v51 = vpop.eup %2480  ;;  %v1251_v42 = vmul.f32 1.442695, %v1226_v37 }
 0x384   : > { %v1198_v11 = vpop.xlane.xlu0 %1197 }
 0x385   : > { %v1232_v32 = vsub.f32 %v2987_v2, %v2999_v10  ;;  %1762 = vst.msk [vmem:[#allocation3 + $0x78] sm:$0xff] %vm1473_vm3, %v2999_v10  ;;  %v3008_v33 = vmax.f32 %v2994_v7, %v1198_v11  ;;  %1322 = vperm.xlu0 %2466, %v1212_v56   ;;  %v1255_v47 = vmul.f32 1.442695, %v1228_v43  ;;  %v3037_v56 = vpop.eup %2482 }
 0x386   : > { %v1196_v34 = vpop.xlane.xlu1 %1195  ;;  %v3040_v57 = vpop.eup %2484 }
 0x387   : > { %v1231_v38 = vsub.f32 %v2994_v7, %v3008_v33  ;;  %1761 = vst.msk [vmem:[#allocation3 + $0x70] sm:$0xff] %vm1473_vm3, %v3008_v33  ;;  %v1214_v9 = vmax.f32 %v1166_v13, %v1196_v34  ;;  %1307 = vperm.xlu1 %2467, %v2968_v52   ;;  %2492 = vpow2.f32 %v1255_v47  ;;  %v3045_v60 = vpop.eup %2486 }
 0x388   : > { %2494 = vpow2.f32 %v1245_v49 }
 0x389   : > { %1760 = vst.msk [vmem:[#allocation3 + $0x68] sm:$0xff] %vm1473_vm3, %v1214_v9  ;;  %1332 = vperm.xlu0 %2466, %v1214_v9   ;;  %v1230_v46 = vsub.f32 %v1166_v13, %v1214_v9  ;;  %2496 = vpow2.f32 %v1251_v42 }
 0x38a   : > { %2498 = vpow2.f32 %v1253_v55  ;;  %v3048_v48 = vpop.eup %2488 }
 0x38b   : > { %1317 = vperm.xlu1 %2467, %v2980_v59   ;;  %v1259_v54 = vmul.f32 1.442695, %v1230_v46  ;;  %v1229_v59 = vsub.f32 %v2982_v62, %v2992_v4  ;;  %v3051_v61 = vpop.eup %2490 }
 0x38d   : > { %1342 = vperm.xlu0 %2466, %v2999_v10   ;;  %2500 = vpow2.f32 %v1259_v54  ;;  %v1257_v52 = vmul.f32 1.442695, %v1229_v59 }
 0x38e   : > { %2502 = vpow2.f32 %v1249_v58 }
 0x38f   : > { %1327 = vperm.xlu1 %2467, %v2992_v4   ;;  %2504 = vpow2.f32 %v1257_v52 }
 0x391   : > { %1508 = vperm.xlu0 %2466, %v3026_v40  }
 0x393   : > { %1337 = vperm.xlu1 %2467, %v3008_v33  }
 0x394   : > { %v3054_v63 = vpop.eup %2492 }
 0x395   : > { %1523 = vperm.xlu0 %2466, %v3031_v51   ;;  %v3057_v62 = vpop.eup %2494 }
 0x396   : > { %v3060_v0 = vpop.eup %2496 }
 0x397   : > { %1513 = vperm.xlu1 %2467, %v3037_v56   ;;  %v3063_v1 = vpop.eup %2498 }
 0x399   : > { %1543 = vperm.xlu0 %2466, %v3040_v57  }
 0x39a   : > { %v3066_v3 = vpop.eup %2500 }
 0x39b   : > { %1518 = vperm.xlu1 %2467, %v3045_v60   ;;  %v3069_v4 = vpop.eup %2502 }
 0x39c   : > { %v3072_v5 = vpop.eup %2504 }
 0x39d   : > { %1533 = vperm.xlu0 %2466, %v3048_v48  }
 0x39f   : > { %1528 = vperm.xlu1 %2467, %v3051_v61  }
 0x3a1   : > { %1563 = vperm.xlu0 %2466, %v3054_v63  }
 0x3a3   : > { %1538 = vperm.xlu1 %2467, %v3057_v62  }
 0x3a5   : > { %1553 = vperm.xlu0 %2466, %v3060_v0  }
 0x3a7   : > { %1558 = vperm.xlu1 %2467, %v3063_v1  }
 0x3a9   : > { %1573 = vperm.xlu0 %2466, %v3066_v3  }
 0x3ab   : > { %1548 = vperm.xlu1 %2467, %v3069_v4  }
 0x3af   : > { %1568 = vperm.xlu1 %2467, %v3072_v5  }
 0x3e4   : > { %v1278_v6 = vpop.permute.xlu1 %1277 }
 0x3e5   : > { %v1347_v8 = vsub.f32 %v2878_v15, %v1278_v6 }
 0x3e6   : > { %v1268_v11 = vpop.permute.xlu0 %1267 }
 0x3e7   : > { %v1365_v13 = vmul.f32 1.442695, %v1347_v8  ;;  %v1345_v14 = vsub.f32 %v2881_v16, %v1268_v11 }
 0x3e8   : > { %v1283_v22 = vpop.permute.xlu1 %1282 }
 0x3e9   : > { %2506 = vpow2.f32 %v1365_v13  ;;  %v1361_v34 = vmul.f32 1.442695, %v1345_v14  ;;  %v1348_v35 = vsub.f32 %v2884_v17, %v1283_v22 }
 0x3eb   : > { %2508 = vpow2.f32 %v1361_v34  ;;  %v1367_v36 = vmul.f32 1.442695, %v1348_v35 }
 0x3ec   : > { %v1273_v9 = vpop.permute.xlu1 %1272 }
 0x3ed   : > { %v1346_v12 = vsub.f32 %v2887_v18, %v1273_v9  ;;  %2510 = vpow2.f32 %v1367_v36 }
 0x3ef   : > { %v1363_v39 = vmul.f32 1.442695, %v1346_v12 }
 0x3f1   : > { %2512 = vpow2.f32 %v1363_v39 }
 0x3f2   : > { %v1298_v41 = vpop.permute.xlu1 %1297 }
 0x3f3   : > { %v1351_v15 = vsub.f32 %v2890_v19, %v1298_v41 }
 0x3f5   : > { %v1373_v43 = vmul.f32 1.442695, %v1351_v15 }
 0x3f6   : > { %v2507_v44 = vpop.eup %2506  ;;  %v1288_v45 = vpop.permute.xlu1 %1287 }
 0x3f7   : > { %2514 = vpow2.f32 %v1373_v43  ;;  %v1349_v16 = vsub.f32 %v2892_v20, %v1288_v45  ;;  %1429 = vadd.xlane.f32.xlu0 %v2507_v44 }
 0x3f8   : > { %v2509_v47 = vpop.eup %2508 }
 0x3f9   : > { %v1369_v17 = vmul.f32 1.442695, %v1349_v16  ;;  %1425 = vadd.xlane.f32.xlu1 %v2509_v47 }
 0x3fa   : > { %v1293_v37 = vpop.permute.xlu1 %1292  ;;  %v2511_v49 = vpop.eup %2510 }
 0x3fb   : > { %2516 = vpow2.f32 %v1369_v17  ;;  %v1350_v18 = vsub.f32 %v2898_v23, %v1293_v37  ;;  %v1603_v58 = vpack.c.bf16 %v2511_v49, %v2507_v44 }
 0x3fc   : > { %v1313_v50 = vpop.permute.xlu0 %1312 }
 0x3fd   : > { %v1371_v42 = vmul.f32 1.442695, %v1350_v18  ;;  %1431 = vadd.xlane.f32.xlu1 %v2511_v49  ;;  %v1354_v19 = vsub.f32 %v2910_v27, %v1313_v50 }
 0x3fe   : > { %v2513_v46 = vpop.eup %2512  ;;  %v1303_v53 = vpop.permute.xlu1 %1302 }
 0x3ff   : > { %2518 = vpow2.f32 %v1371_v42  ;;  %v1352_v55 = vsub.f32 %v2895_v21, %v1303_v53  ;;  %1427 = vadd.xlane.f32.xlu0 %v2513_v46  ;;  %v1602_v20 = vpack.c.bf16 %v2513_v46, %v2509_v47  ;;  %v1379_v52 = vmul.f32 1.442695, %v1354_v19 }
 0x400   : > { %v1323_v54 = vpop.permute.xlu0 %1322 }
 0x401   : > { %v1375_v59 = vmul.f32 1.442695, %v1352_v55  ;;  %2387 = vmatprep.mubr.bf16.mxu1 %v1602_v20  ;;  %v1356_v23 = vsub.f32 %v2907_v26, %v1323_v54  ;;  %v1261_v55 = vmul.f32 1.442695, %v1231_v38  ;;  %v1263_v20 = vmul.f32 1.442695, %v1232_v32 }
 0x402   : > { %2388 = vmatmul.mubr.bf16.vlgmr.msra.gmra.mxu1 %v1603_v58  ;;  %v1308_v6 = vpop.permute.xlu1 %1307 }
 0x403   : > { %2520 = vpow2.f32 %v1375_v59  ;;  %v1353_v8 = vsub.f32 %v2904_v25, %v1308_v6  ;;  %v1383_v21 = vmul.f32 1.442695, %v1356_v23 }
 0x404   : > { %v2515_v11 = vpop.eup %2514  ;;  %v1333_v27 = vpop.permute.xlu0 %1332  ;;  %2522 = vpow2.f32 %v1379_v52 }
 0x405   : > { %v1377_v13 = vmul.f32 1.442695, %v1353_v8  ;;  %1437 = vadd.xlane.f32.xlu0 %v2515_v11  ;;  %v1358_v14 = vsub.f32 %v2923_v31, %v1333_v27 }
 0x406   : > { %v1318_v22 = vpop.permute.xlu1 %1317 }
 0x407   : > { %2524 = vpow2.f32 %v1377_v13  ;;  %v1355_v34 = vsub.f32 %v2901_v24, %v1318_v22  ;;  %v1387_v9 = vmul.f32 1.442695, %v1358_v14  ;;  %v1395_v13 = vld [vmem:[#allocation4 + $0x10] sm:$0xff]  ;;  %v1393_v14 = vld [vmem:[#allocation4] sm:$0xff] }
 0x408   : > { %v2517_v35 = vpop.eup %2516  ;;  %v1343_v36 = vpop.permute.xlu0 %1342  ;;  %2526 = vpow2.f32 %v1383_v21  ;;  %v1411_v22 = vmul.f32 %v3045_v60, %v1395_v13 }
 0x409   : > { %v1381_v26 = vmul.f32 1.442695, %v1355_v34  ;;  %1433 = vadd.xlane.f32.xlu0 %v2517_v35  ;;  %v1360_v25 = vsub.f32 %v2919_v30, %v1343_v36  ;;  %v1409_v36 = vmul.f32 %v3026_v40, %v1393_v14 }
 0x40a   : > { %v1328_v12 = vpop.permute.xlu1 %1327 }
 0x40b   : > { %2528 = vpow2.f32 %v1381_v26  ;;  %v1357_v39 = vsub.f32 %v2916_v29, %v1328_v12  ;;  %v1391_v31 = vmul.f32 1.442695, %v1360_v25  ;;  %v1394_v12 = vld [vmem:[#allocation4 + $0x8] sm:$0xff] }
 0x40c   : > { %v2519_v41 = vpop.eup %2518  ;;  %2530 = vpow2.f32 %v1387_v9  ;;  %v3103_v59 = vpop.permute.xlu0 %1508  ;;  %v1396_v9 = vld [vmem:[#allocation4 + $0x18] sm:$0xff] }
 0x40d   : > { %v1385_v15 = vmul.f32 1.442695, %v1357_v39  ;;  %v1604_v43 = vpack.c.bf16 %v2519_v41, %v2517_v35  ;;  %v1412_v39 = vmul.f32 %v3031_v51, %v1396_v9 }
 0x40e   : > { %v1338_v44 = vpop.permute.xlu1 %1337 }
 0x40f   : > { %2532 = vpow2.f32 %v1385_v15  ;;  %v1359_v24 = vsub.f32 %v2913_v28, %v1338_v44  ;;  %2391 = vmatprep.mubr.bf16.mxu1 %v1604_v43  ;;  %v1410_v43 = vmul.f32 %v3037_v56, %v1394_v12  ;;  %v1399_v44 = vld [vmem:[#allocation4 + $0x30] sm:$0xff]  ;;  %v1400_v56 = vld [vmem:[#allocation4 + $0x38] sm:$0xff] }
 0x410   : > { %v2521_v45 = vpop.eup %2520  ;;  %2534 = vpow2.f32 %v1391_v31  ;;  %v3107_v33 = vpop.permute.xlu0 %1523  ;;  %v1415_v40 = vmul.f32 %v3057_v62, %v1399_v44 }
 0x411   : > { %v1389_v16 = vmul.f32 1.442695, %v1359_v24  ;;  %1439 = vadd.xlane.f32.xlu1 %v2521_v45  ;;  %v1605_v47 = vpack.c.bf16 %v2521_v45, %v2515_v11  ;;  %v2523_v30 = vpop.eup %2522  ;;  %v1397_v45 = vld [vmem:[#allocation4 + $0x20] sm:$0xff] }
 0x412   : > { %v3105_v7 = vpop.permute.xlu1 %1513  ;;  %v1413_v51 = vmul.f32 %v3051_v61, %v1397_v45  ;;  %v1493_v45 = vld [vmem:[#allocation5 + $0x18] sm:$0xff] }
 0x413   : > { %2536 = vpow2.f32 %v1389_v16  ;;  %2392 = vmatmul.mubr.bf16.gmra.mxu1 %v1605_v47 }
 0x414   : > { %v2525_v17 = vpop.eup %2524  ;;  %2538 = vpow2.f32 %v1261_v55  ;;  %v3111_v52 = vpop.permute.xlu0 %1543  ;;  %v1402_v55 = vld [vmem:[#allocation4 + $0x48] sm:$0xff] }
 0x415   : > { %1435 = vadd.xlane.f32.xlu1 %v2519_v41  ;;  %v1606_v29 = vpack.c.bf16 %v2523_v30, %v2525_v17  ;;  %v2527_v37 = vpop.eup %2526  ;;  %2540 = vpow2.f32 %v1263_v20  ;;  %v1418_v14 = vmul.f32 %v3060_v0, %v1402_v55 }
 0x416   : > { %v3109_v38 = vpop.permute.xlu1 %1518 }
 0x417   : > { %2395 = vmatprep.mubr.bf16.mxu1 %v1606_v29 }
 0x418   : > { %v2529_v18 = vpop.eup %2528  ;;  %v3115_v10 = vpop.permute.xlu0 %1533 }
 0x419   : > { %1447 = vadd.xlane.f32.xlu1 %v2527_v37  ;;  %1445 = vadd.xlane.f32.xlu0 %v2529_v18  ;;  %v1607_v49 = vpack.c.bf16 %v2527_v37, %v2529_v18  ;;  %v2531_v50 = vpop.eup %2530  ;;  %v1398_v37 = vld [vmem:[#allocation4 + $0x28] sm:$0xff] }
 0x41a   : > { %v3113_v2 = vpop.permute.xlu1 %1528  ;;  %v1414_v62 = vmul.f32 %v3048_v48, %v1398_v37 }
 0x41b   : > { %2396 = vmatmul.mubr.bf16.gmra.mxu1 %v1607_v49 }
 0x41c   : > { %v2533_v28 = vpop.eup %2532  ;;  %v3119_v23 = vpop.permute.xlu0 %1563 }
 0x41d   : > { %1443 = vadd.xlane.f32.xlu1 %v2523_v30  ;;  %1441 = vadd.xlane.f32.xlu0 %v2525_v17  ;;  %v1608_v42 = vpack.c.bf16 %v2531_v50, %v2533_v28  ;;  %v2535_v46 = vpop.eup %2534  ;;  %v1416_v17 = vmul.f32 %v3040_v57, %v1400_v56  ;;  %v1401_v57 = vld [vmem:[#allocation4 + $0x40] sm:$0xff] }
 0x41e   : > { %v3117_v32 = vpop.permute.xlu1 %1538  ;;  %v1417_v48 = vmul.f32 %v3069_v4, %v1401_v57  ;;  %v1406_v4 = vld [vmem:[#allocation4 + $0x68] sm:$0xff] }
 0x41f   : > { %2399 = vmatprep.mubr.bf16.mxu1 %v1608_v42 }
 0x420   : > { %v2537_v19 = vpop.eup %2536  ;;  %v3123_v8 = vpop.permute.xlu0 %1553 }
 0x421   : > { %1455 = vadd.xlane.f32.xlu1 %v2535_v46  ;;  %1453 = vadd.xlane.f32.xlu0 %v2537_v19  ;;  %v1609_v53 = vpack.c.bf16 %v2535_v46, %v2537_v19  ;;  %v3097_v54 = vpop.eup %2538 }
 0x422   : > { %v3100_v58 = vpop.eup %2540  ;;  %v3121_v6 = vpop.permute.xlu1 %1558 }
 0x423   : > { %2400 = vmatmul.mubr.bf16.gmra.mxu1 %v1609_v53 }
 0x424   : > { %v3127_v27 = vpop.permute.xlu0 %1573 }
 0x425   : > { %1451 = vadd.xlane.f32.xlu1 %v2531_v50  ;;  %1449 = vadd.xlane.f32.xlu0 %v2533_v28  ;;  %v1403_v50 = vld [vmem:[#allocation4 + $0x50] sm:$0xff]  ;;  %v1404_v28 = vld [vmem:[#allocation4 + $0x58] sm:$0xff] }
 0x426   : > { %v3125_v11 = vpop.permute.xlu1 %1548  ;;  %v1419_v61 = vmul.f32 %v3063_v1, %v1403_v50  ;;  %v1420_v46 = vmul.f32 %v3054_v63, %v1404_v28  ;;  %v1408_v1 = vld [vmem:[#allocation4 + $0x78] sm:$0xff] }
 0x427   : > { %v1424_v9 = vmul.f32 %v3100_v58, %v1408_v1 }
 0x42a   : > { %v3129_v21 = vpop.permute.xlu1 %1568 }
 0x436   : > { %1578 = vperm.xlu1 %2467, %v3097_v54  }
 0x43b   : > { %1583 = vperm.xlu0 %2466, %v3100_v58   ;;  %v1492_v58 = vld [vmem:[#allocation5 + $0x10] sm:$0xff] }
 0x480   : > { %v1430_v34 = vpop.xlane.xlu0 %1429 }
 0x481   : > { %v1459_v35 = vadd.f32 %v1430_v34, %v1411_v22 }
 0x482   : > { %v1426_v26 = vpop.xlane.xlu1 %1425 }
 0x483   : > { %1476 = vst.msk [vmem:[#allocation4 + $0x10] sm:$0xff] %vm1473_vm3, %v1459_v35  ;;  %v1457_v25 = vadd.f32 %v1426_v26, %v1409_v36  ;;  %v1407_v35 = vld [vmem:[#allocation4 + $0x70] sm:$0xff] }
 0x484   : > { %v1423_v26 = vmul.f32 %v3097_v54, %v1407_v35  ;;  %v1499_v35 = vld [vmem:[#allocation5 + $0x48] sm:$0xff] }
 0x485   : > { %1474 = vst.msk [vmem:[#allocation4] sm:$0xff] %vm1473_vm3, %v1457_v25 }
 0x486   : > { %v1432_v41 = vpop.xlane.xlu1 %1431 }
 0x487   : > { %v1460_v15 = vadd.f32 %v1432_v41, %v1412_v39  ;;  %v1405_v39 = vld [vmem:[#allocation4 + $0x60] sm:$0xff] }
 0x488   : > { %v1428_v31 = vpop.xlane.xlu0 %1427 }
 0x489   : > { %1477 = vst.msk [vmem:[#allocation4 + $0x18] sm:$0xff] %vm1473_vm3, %v1460_v15  ;;  %v1458_v60 = vadd.f32 %v1428_v31, %v1410_v43  ;;  %v1421_v15 = vmul.f32 %v3072_v5, %v1405_v39  ;;  %v1422_v43 = vmul.f32 %v3066_v3, %v1406_v4  ;;  %v1491_v5 = vld [vmem:[#allocation5 + $0x8] sm:$0xff]  ;;  %v1589_v3 = vmul.f32 %v3107_v33, %v1493_v45  ;;  %v1497_v33 = vld [vmem:[#allocation5 + $0x38] sm:$0xff] }
 0x48b   : > { %1475 = vst.msk [vmem:[#allocation4 + $0x8] sm:$0xff] %vm1473_vm3, %v1458_v60 }
 0x48e   : > { %v1438_v24 = vpop.xlane.xlu0 %1437 }
 0x48f   : > { %v1463_v16 = vadd.f32 %v1438_v24, %v1415_v40  ;;  %v1490_v40 = vld [vmem:[#allocation5] sm:$0xff]  ;;  %v1588_v24 = vmul.f32 %v3109_v38, %v1492_v58 }
 0x491   : > { %1480 = vst.msk [vmem:[#allocation4 + $0x30] sm:$0xff] %vm1473_vm3, %v1463_v16 }
 0x492   : > { %v1434_v47 = vpop.xlane.xlu0 %1433 }
 0x493   : > { %v1461_v30 = vadd.f32 %v1434_v47, %v1413_v51  ;;  %v1586_v51 = vmul.f32 %v3103_v59, %v1490_v40  ;;  %v1496_v59 = vld [vmem:[#allocation5 + $0x30] sm:$0xff] }
 0x495   : > { %1478 = vst.msk [vmem:[#allocation4 + $0x20] sm:$0xff] %vm1473_vm3, %v1461_v30 }
 0x49a   : > { %v1440_v29 = vpop.xlane.xlu1 %1439 }
 0x49b   : > { %v1464_v18 = vadd.f32 %v1440_v29, %v1416_v17  ;;  %v1587_v29 = vmul.f32 %v3105_v7, %v1491_v5 }
 0x49d   : > { %1481 = vst.msk [vmem:[#allocation4 + $0x38] sm:$0xff] %vm1473_vm3, %v1464_v18 }
 0x49e   : > { %v1436_v49 = vpop.xlane.xlu1 %1435 }
 0x49f   : > { %v1462_v42 = vadd.f32 %v1436_v49, %v1414_v62  ;;  %v1494_v62 = vld [vmem:[#allocation5 + $0x20] sm:$0xff]  ;;  %v1592_v49 = vmul.f32 %v3117_v32, %v1496_v59 }
 0x4a0   : > { %v1590_v28 = vmul.f32 %v3113_v2, %v1494_v62  ;;  %v1498_v32 = vld [vmem:[#allocation5 + $0x40] sm:$0xff] }
 0x4a1   : > { %1479 = vst.msk [vmem:[#allocation4 + $0x28] sm:$0xff] %vm1473_vm3, %v1462_v42 }
 0x4a2   : > { %v1446_v19 = vpop.xlane.xlu0 %1445  ;;  %v1448_v53 = vpop.xlane.xlu1 %1447 }
 0x4a3   : > { %v1467_v20 = vadd.f32 %v1446_v19, %v1419_v61  ;;  %v1468_v13 = vadd.f32 %v1448_v53, %v1420_v46  ;;  %v1495_v61 = vld [vmem:[#allocation5 + $0x28] sm:$0xff]  ;;  %v1593_v46 = vmul.f32 %v3111_v52, %v1497_v33  ;;  %v1500_v53 = vld [vmem:[#allocation5 + $0x50] sm:$0xff]  ;;  %v1594_v52 = vmul.f32 %v3125_v11, %v1498_v32 }
 0x4a4   : > { %v1591_v55 = vmul.f32 %v3115_v10, %v1495_v61 }
 0x4a5   : > { %1484 = vst.msk [vmem:[#allocation4 + $0x50] sm:$0xff] %vm1473_vm3, %v1467_v20  ;;  %1485 = vst.msk [vmem:[#allocation4 + $0x58] sm:$0xff] %vm1473_vm3, %v1468_v13 }
 0x4a6   : > { %v1442_v22 = vpop.xlane.xlu0 %1441  ;;  %v1444_v34 = vpop.xlane.xlu1 %1443 }
 0x4a7   : > { %v1465_v36 = vadd.f32 %v1442_v22, %v1417_v48  ;;  %v1466_v63 = vadd.f32 %v1444_v34, %v1418_v14  ;;  %v1596_v48 = vmul.f32 %v3121_v6, %v1500_v53  ;;  %v1501_v14 = vld [vmem:[#allocation5 + $0x58] sm:$0xff] }
 0x4a8   : > { %v1597_v10 = vmul.f32 %v3119_v23, %v1501_v14 }
 0x4a9   : > { %1482 = vst.msk [vmem:[#allocation4 + $0x40] sm:$0xff] %vm1473_vm3, %v1465_v36  ;;  %1483 = vst.msk [vmem:[#allocation4 + $0x48] sm:$0xff] %vm1473_vm3, %v1466_v63  ;;  %v1504_v63 = vld [vmem:[#allocation5 + $0x70] sm:$0xff] }
 0x4aa   : > { %v1454_v25 = vpop.xlane.xlu0 %1453  ;;  %v1456_v12 = vpop.xlane.xlu1 %1455 }
 0x4ab   : > { %v1471_v41 = vadd.f32 %v1454_v25, %v1423_v26  ;;  %v1472_v0 = vadd.f32 %v1456_v12, %v1424_v9  ;;  %v1595_v9 = vmul.f32 %v3123_v8, %v1499_v35  ;;  %v1502_v12 = vld [vmem:[#allocation5 + $0x60] sm:$0xff] }
 0x4ad   : > { %1488 = vst.msk [vmem:[#allocation4 + $0x70] sm:$0xff] %vm1473_vm3, %v1471_v41  ;;  %1489 = vst.msk [vmem:[#allocation4 + $0x78] sm:$0xff] %vm1473_vm3, %v1472_v0  ;;  %v1505_v41 = vld [vmem:[#allocation5 + $0x78] sm:$0xff] }
 0x4ae   : > { %v1450_v31 = vpop.xlane.xlu0 %1449  ;;  %v1452_v60 = vpop.xlane.xlu1 %1451 }
 0x4af   : > { %v1469_v44 = vadd.f32 %v1450_v31, %v1421_v15  ;;  %v1470_v54 = vadd.f32 %v1452_v60, %v1422_v43  ;;  %v1598_v15 = vmul.f32 %v3129_v21, %v1502_v12  ;;  %v1503_v31 = vld [vmem:[#allocation5 + $0x68] sm:$0xff] }
 0x4b0   : > { %v1599_v58 = vmul.f32 %v3127_v27, %v1503_v31 }
 0x4b1   : > { %1486 = vst.msk [vmem:[#allocation4 + $0x60] sm:$0xff] %vm1473_vm3, %v1469_v44  ;;  %1487 = vst.msk [vmem:[#allocation4 + $0x68] sm:$0xff] %vm1473_vm3, %v1470_v54 }
 0x4b2   : > { %v1579_v26 = vpop.permute.xlu1 %1578 }
 0x4b3   : > { %v1600_v39 = vmul.f32 %v1579_v26, %v1504_v63 }
 0x4b6   : > { %v1584_v0 = vpop.permute.xlu0 %1583 }
 0x4b7   : > { %v1601_v8 = vmul.f32 %v1584_v0, %v1505_v41 }
 0x4c2   : > { %v2389_v16 = vpop.f32.mrf.mxu1 }
 0x4c3   : > { %v1717_v47 = vadd.f32 %v2389_v16, %v1588_v24 }
 0x4c4   : > { %v1652_v30 = vpop.f32.mrf.mxu1 }
 0x4c5   : > { %1733 = vst.msk [vmem:[#allocation5 + $0x10] sm:$0xff] %vm750_vm2, %v1717_v47  ;;  %v1715_v56 = vadd.f32 %v1652_v30, %v1586_v51 }
 0x4c6   : > { %v2390_v17 = vpop.f32.mrf.mxu1 }
 0x4c7   : > { %1731 = vst.msk [vmem:[#allocation5] sm:$0xff] %vm750_vm2, %v1715_v56  ;;  %v1718_v37 = vadd.f32 %v2390_v17, %v1589_v3 }
 0x4c8   : > { %v1655_v18 = vpop.f32.mrf.mxu1 }
 0x4c9   : > { %1734 = vst.msk [vmem:[#allocation5 + $0x18] sm:$0xff] %vm750_vm2, %v1718_v37  ;;  %v1716_v38 = vadd.f32 %v1655_v18, %v1587_v29 }
 0x4cb   : > { %1732 = vst.msk [vmem:[#allocation5 + $0x8] sm:$0xff] %vm750_vm2, %v1716_v38 }
 0x4d3   : > { %v2393_v50 = vpop.f32.mrf.mxu1 }
 0x4d4   : > { %v1721_v42 = vadd.f32 %v2393_v50, %v1592_v49 }
 0x4d5   : > { %v1668_v7 = vpop.f32.mrf.mxu1 }
 0x4d6   : > { %1737 = vst.msk [vmem:[#allocation5 + $0x30] sm:$0xff] %vm750_vm2, %v1721_v42  ;;  %v1719_v19 = vadd.f32 %v1668_v7, %v1590_v28 }
 0x4d7   : > { %v2394_v57 = vpop.f32.mrf.mxu1 }
 0x4d8   : > { %1735 = vst.msk [vmem:[#allocation5 + $0x20] sm:$0xff] %vm750_vm2, %v1719_v19  ;;  %v1722_v20 = vadd.f32 %v2394_v57, %v1593_v46 }
 0x4d9   : > { %v1671_v13 = vpop.f32.mrf.mxu1 }
 0x4da   : > { %1738 = vst.msk [vmem:[#allocation5 + $0x38] sm:$0xff] %vm750_vm2, %v1722_v20  ;;  %v1720_v2 = vadd.f32 %v1671_v13, %v1591_v55 }
 0x4db   : > { %v2397_v22 = vpop.f32.mrf.mxu1 }
 0x4dc   : > { %1736 = vst.msk [vmem:[#allocation5 + $0x28] sm:$0xff] %vm750_vm2, %v1720_v2  ;;  %v1725_v34 = vadd.f32 %v2397_v22, %v1596_v48 }
 0x4dd   : > { %v1684_v1 = vpop.f32.mrf.mxu1 }
 0x4de   : > { %1741 = vst.msk [vmem:[#allocation5 + $0x50] sm:$0xff] %vm750_vm2, %v1725_v34  ;;  %v1723_v36 = vadd.f32 %v1684_v1, %v1594_v52 }
 0x4df   : > { %v2398_v6 = vpop.f32.mrf.mxu1 }
 0x4e0   : > { %1739 = vst.msk [vmem:[#allocation5 + $0x40] sm:$0xff] %vm750_vm2, %v1723_v36  ;;  %v1726_v25 = vadd.f32 %v2398_v6, %v1597_v10 }
 0x4e1   : > { %v1687_v11 = vpop.f32.mrf.mxu1 }
 0x4e2   : > { %1742 = vst.msk [vmem:[#allocation5 + $0x58] sm:$0xff] %vm750_vm2, %v1726_v25  ;;  %v1724_v4 = vadd.f32 %v1687_v11, %v1595_v9 }
 0x4e3   : > { %v2401_v23 = vpop.f32.mrf.mxu1 }
 0x4e4   : > { %1740 = vst.msk [vmem:[#allocation5 + $0x48] sm:$0xff] %vm750_vm2, %v1724_v4  ;;  %v1729_v43 = vadd.f32 %v2401_v23, %v1600_v39 }
 0x4e5   : > { %v1700_v60 = vpop.f32.mrf.mxu1 }
 0x4e6   : > { %1745 = vst.msk [vmem:[#allocation5 + $0x70] sm:$0xff] %vm750_vm2, %v1729_v43  ;;  %v1727_v44 = vadd.f32 %v1700_v60, %v1598_v15 }
 0x4e7   : > { %v2402_v54 = vpop.f32.mrf.mxu1 }
 0x4e8   : > { %1743 = vst.msk [vmem:[#allocation5 + $0x60] sm:$0xff] %vm750_vm2, %v1727_v44  ;;  %v1730_v40 = vadd.f32 %v2402_v54, %v1601_v8  ;;  %1766 = sbr.rel (%p2160_p10) target bundleno = 1436 (0x59c), region = 64 }
 0x4e9   : > { %v1703_v24 = vpop.f32.mrf.mxu1 }
 0x4ea   : > { %1746 = vst.msk [vmem:[#allocation5 + $0x78] sm:$0xff] %vm750_vm2, %v1730_v40  ;;  %v1728_v45 = vadd.f32 %v1703_v24, %v1599_v58 }
 0x4ec   : > { %1744 = vst.msk [vmem:[#allocation5 + $0x68] sm:$0xff] %vm750_vm2, %v1728_v45 }
 0x4ed   : > { %v1770_v21 = vld [vmem:[#allocation4 + $0x10] sm:$0xff]  ;;  %v1768_v16 = vld [vmem:[#allocation4] sm:$0xff]  ;;  %v1771_v51 = vld [vmem:[#allocation4 + $0x18] sm:$0xff]  ;;  %v2635_v47 = vmov 0   ;;  %v3194_v34 = vstv %s1767_s11 }
 0x4ee   : > { %2543 = vset.pattern.permute.xlu1 %v2635_v47  ;;  %2542 = vset.pattern.permute.xlu0 %v2635_v47  ;;  %2544 = vrcp.f32 %v1770_v21  ;;  %v1769_v27 = vld [vmem:[#allocation4 + $0x8] sm:$0xff]  ;;  %v1772_v30 = vld [vmem:[#allocation4 + $0x20] sm:$0xff]  ;;  %v1775_v3 = vld [vmem:[#allocation4 + $0x38] sm:$0xff] }
 0x4ef   : > { %2546 = vrcp.f32 %v1768_v16  ;;  %v1773_v5 = vld [vmem:[#allocation4 + $0x28] sm:$0xff]  ;;  %v1774_v56 = vld [vmem:[#allocation4 + $0x30] sm:$0xff]  ;;  %v1776_v29 = vld [vmem:[#allocation4 + $0x40] sm:$0xff] }
 0x4f0   : > { %2548 = vrcp.f32 %v1771_v51  ;;  %v1777_v17 = vld [vmem:[#allocation4 + $0x48] sm:$0xff]  ;;  %v1779_v59 = vld [vmem:[#allocation4 + $0x58] sm:$0xff]  ;;  %v1778_v49 = vld [vmem:[#allocation4 + $0x50] sm:$0xff] }
 0x4f1   : > { %2550 = vrcp.f32 %v1769_v27  ;;  %v1781_v50 = vld [vmem:[#allocation4 + $0x68] sm:$0xff]  ;;  %v1780_v42 = vld [vmem:[#allocation4 + $0x60] sm:$0xff]  ;;  %v1783_v7 = vld [vmem:[#allocation4 + $0x78] sm:$0xff] }
 0x4f2   : > { %2552 = vrcp.f32 %v1773_v5  ;;  %v1782_v19 = vld [vmem:[#allocation4 + $0x70] sm:$0xff]  ;;  %v1800_v22 = vld [vmem:[#allocation5] sm:$0xff]  ;;  %v1803_v63 = vld [vmem:[#allocation5 + $0x18] sm:$0xff] }
 0x4f3   : > { %2554 = vrcp.f32 %v1772_v30  ;;  %v1802_v14 = vld [vmem:[#allocation5 + $0x10] sm:$0xff]  ;;  %v1929_v6 = vld [vmem:[%s2737_s27] sm:$0xff]  ;;  %v1801_v9 = vld [vmem:[#allocation5 + $0x8] sm:$0xff] }
 0x4f4   : > { %2556 = vrcp.f32 %v1775_v3  ;;  %v1931_v10 = vld [vmem:[%s2737_s27 + $0x10] sm:$0xff]  ;;  %v1932_v0 = vld [vmem:[%s2737_s27 + $0x18] sm:$0xff]  ;;  %v1805_v15 = vld [vmem:[#allocation5 + $0x28] sm:$0xff] }
 0x4f5   : > { %2558 = vrcp.f32 %v1774_v56  ;;  %v1930_v31 = vld [vmem:[%s2737_s27 + $0x8] sm:$0xff]  ;;  %v1804_v60 = vld [vmem:[#allocation5 + $0x20] sm:$0xff]  ;;  %v1807_v16 = vld [vmem:[#allocation5 + $0x38] sm:$0xff] }
 0x4f6   : > { %2560 = vrcp.f32 %v1777_v17  ;;  %v1934_v45 = vld [vmem:[%s2737_s27 + $0x28] sm:$0xff]  ;;  %v1933_v47 = vld [vmem:[%s2737_s27 + $0x20] sm:$0xff]  ;;  %v1806_v27 = vld [vmem:[#allocation5 + $0x30] sm:$0xff] }
 0x4f7   : > { %2562 = vrcp.f32 %v1776_v29 }
 0x4f8   : > { %2564 = vrcp.f32 %v1779_v59 }
 0x4f9   : > { %2566 = vrcp.f32 %v1778_v49  ;;  %v1808_v49 = vld [vmem:[#allocation5 + $0x40] sm:$0xff] }
 0x4fa   : > { %2568 = vrcp.f32 %v1781_v50 }
 0x4fb   : > { %v2545_v37 = vpop.eup %2544  ;;  %2570 = vrcp.f32 %v1780_v42 }
 0x4fc   : > { %v2547_v18 = vpop.eup %2546  ;;  %1828 = vperm.xlu1 %2543, %v2545_v37   ;;  %2572 = vrcp.f32 %v1783_v7  ;;  %v1936_v37 = vld [vmem:[%s2737_s27 + $0x38] sm:$0xff] }
 0x4fd   : > { %v2549_v38 = vpop.eup %2548  ;;  %1818 = vperm.xlu0 %2542, %v2547_v18   ;;  %2574 = vrcp.f32 %v1782_v19 }
 0x4fe   : > { %v2551_v62 = vpop.eup %2550 }
 0x4ff   : > { %v2553_v33 = vpop.eup %2552 }
 0x500   : > { %1833 = vperm.xlu1 %2543, %v2549_v38   ;;  %v2555_v28 = vpop.eup %2554  ;;  %v1809_v38 = vld [vmem:[#allocation5 + $0x48] sm:$0xff] }
 0x501   : > { %1823 = vperm.xlu0 %2542, %v2551_v62   ;;  %v2557_v61 = vpop.eup %2556  ;;  %v1935_v62 = vld [vmem:[%s2737_s27 + $0x30] sm:$0xff] }
 0x502   : > { %v2559_v46 = vpop.eup %2558 }
 0x503   : > { %v2561_v53 = vpop.eup %2560 }
 0x504   : > { %1843 = vperm.xlu1 %2543, %v2553_v33   ;;  %v2563_v57 = vpop.eup %2562 }
 0x505   : > { %1838 = vperm.xlu0 %2542, %v2555_v28   ;;  %v2565_v55 = vpop.eup %2564 }
 0x506   : > { %v2567_v20 = vpop.eup %2566 }
 0x507   : > { %v2569_v32 = vpop.eup %2568 }
 0x508   : > { %1853 = vperm.xlu1 %2543, %v2557_v61   ;;  %v2571_v13 = vpop.eup %2570 }
 0x509   : > { %1848 = vperm.xlu0 %2542, %v2559_v46   ;;  %v2573_v48 = vpop.eup %2572  ;;  %v1938_v46 = vld [vmem:[%s2737_s27 + $0x48] sm:$0xff] }
 0x50a   : > { %v2575_v2 = vpop.eup %2574 }
 0x50c   : > { %1863 = vperm.xlu1 %2543, %v2561_v53   ;;  %v1811_v53 = vld [vmem:[#allocation5 + $0x58] sm:$0xff] }
 0x50d   : > { %1858 = vperm.xlu0 %2542, %v2563_v57  }
 0x510   : > { %1873 = vperm.xlu1 %2543, %v2565_v55   ;;  %v1937_v55 = vld [vmem:[%s2737_s27 + $0x40] sm:$0xff] }
 0x511   : > { %1868 = vperm.xlu0 %2542, %v2567_v20   ;;  %v1810_v20 = vld [vmem:[#allocation5 + $0x50] sm:$0xff] }
 0x514   : > { %1883 = vperm.xlu1 %2543, %v2569_v32  }
 0x515   : > { %1878 = vperm.xlu0 %2542, %v2571_v13  }
 0x518   : > { %1893 = vperm.xlu1 %2543, %v2573_v48  }
 0x519   : > { %1888 = vperm.xlu0 %2542, %v2575_v2  }
 0x577   : > { %v1829_v52 = vpop.permute.xlu1 %1828 }
 0x578   : > { %v1898_v35 = vmul.f32 %v1829_v52, %v1802_v14  ;;  %v1819_v1 = vpop.permute.xlu0 %1818  ;;  %v1940_v52 = vld [vmem:[%s2737_s27 + $0x58] sm:$0xff] }
 0x579   : > { %v1896_v36 = vmul.f32 %v1819_v1, %v1800_v22  ;;  %v1813_v1 = vld [vmem:[#allocation5 + $0x68] sm:$0xff] }
 0x57a   : > { %v1915_v26 = vmul.f32 %v3194_v34, %v1898_v35 }
 0x57b   : > { %v1913_v25 = vmul.f32 %v3194_v34, %v1896_v36  ;;  %v1834_v12 = vpop.permute.xlu1 %1833  ;;  %v1939_v36 = vld [vmem:[%s2737_s27 + $0x50] sm:$0xff] }
 0x57c   : > { %v1947_v11 = vadd.f32 %v1931_v10, %v1915_v26  ;;  %v1899_v39 = vmul.f32 %v1834_v12, %v1803_v63  ;;  %v1824_v4 = vpop.permute.xlu0 %1823  ;;  %v1812_v63 = vld [vmem:[#allocation5 + $0x60] sm:$0xff] }
 0x57d   : > { %v1945_v41 = vadd.f32 %v1929_v6, %v1913_v25  ;;  %v1897_v23 = vmul.f32 %v1824_v4, %v1801_v9 }
 0x57e   : > { %1963 = vst.msk [vmem:[%s2742_s30 + $0x10] sm:$0xff] %vm750_vm2, %v1947_v11  ;;  %v1916_v43 = vmul.f32 %v3194_v34, %v1899_v39  ;;  %v1942_v39 = vld [vmem:[%s2737_s27 + $0x68] sm:$0xff] }
 0x57f   : > { %1961 = vst.msk [vmem:[%s2742_s30] sm:$0xff] %vm750_vm2, %v1945_v41  ;;  %v1914_v8 = vmul.f32 %v3194_v34, %v1897_v23  ;;  %v1844_v44 = vpop.permute.xlu1 %1843  ;;  %v1815_v41 = vld [vmem:[#allocation5 + $0x78] sm:$0xff]  ;;  %v1941_v23 = vld [vmem:[%s2737_s27 + $0x60] sm:$0xff] }
 0x580   : > { %v1948_v54 = vadd.f32 %v1932_v0, %v1916_v43  ;;  %v1901_v58 = vmul.f32 %v1844_v44, %v1805_v15  ;;  %v1839_v40 = vpop.permute.xlu0 %1838  ;;  %v1814_v15 = vld [vmem:[#allocation5 + $0x70] sm:$0xff] }
 0x581   : > { %v1946_v24 = vadd.f32 %v1930_v31, %v1914_v8  ;;  %v1900_v21 = vmul.f32 %v1839_v40, %v1804_v60 }
 0x582   : > { %1964 = vst.msk [vmem:[%s2742_s30 + $0x18] sm:$0xff] %vm750_vm2, %v1948_v54  ;;  %v1918_v51 = vmul.f32 %v3194_v34, %v1901_v58  ;;  %v1944_v58 = vld [vmem:[%s2737_s27 + $0x78] sm:$0xff] }
 0x583   : > { %1962 = vst.msk [vmem:[%s2742_s30 + $0x8] sm:$0xff] %vm750_vm2, %v1946_v24  ;;  %v1917_v5 = vmul.f32 %v3194_v34, %v1900_v21  ;;  %v1854_v30 = vpop.permute.xlu1 %1853 }
 0x584   : > { %v1950_v3 = vadd.f32 %v1934_v45, %v1918_v51  ;;  %v1903_v56 = vmul.f32 %v1854_v30, %v1807_v16  ;;  %v1849_v17 = vpop.permute.xlu0 %1848  ;;  %v1943_v45 = vld [vmem:[%s2737_s27 + $0x70] sm:$0xff] }
 0x585   : > { %v1949_v29 = vadd.f32 %v1933_v47, %v1917_v5  ;;  %v1902_v18 = vmul.f32 %v1849_v17, %v1806_v27 }
 0x586   : > { %1966 = vst.msk [vmem:[%s2742_s30 + $0x28] sm:$0xff] %vm750_vm2, %v1950_v3  ;;  %v1920_v59 = vmul.f32 %v3194_v34, %v1903_v56 }
 0x587   : > { %1965 = vst.msk [vmem:[%s2742_s30 + $0x20] sm:$0xff] %vm750_vm2, %v1949_v29  ;;  %v1919_v33 = vmul.f32 %v3194_v34, %v1902_v18  ;;  %v1864_v50 = vpop.permute.xlu1 %1863 }
 0x588   : > { %v1952_v28 = vadd.f32 %v1936_v37, %v1920_v59  ;;  %v1905_v42 = vmul.f32 %v1864_v50, %v1809_v38  ;;  %v1859_v61 = vpop.permute.xlu0 %1858 }
 0x589   : > { %v1951_v7 = vadd.f32 %v1935_v62, %v1919_v33  ;;  %v1904_v19 = vmul.f32 %v1859_v61, %v1808_v49 }
 0x58a   : > { %1968 = vst.msk [vmem:[%s2742_s30 + $0x38] sm:$0xff] %vm750_vm2, %v1952_v28  ;;  %v1922_v57 = vmul.f32 %v3194_v34, %v1905_v42 }
 0x58b   : > { %1967 = vst.msk [vmem:[%s2742_s30 + $0x30] sm:$0xff] %vm750_vm2, %v1951_v7  ;;  %v1921_v32 = vmul.f32 %v3194_v34, %v1904_v19  ;;  %v1874_v13 = vpop.permute.xlu1 %1873 }
 0x58c   : > { %v1954_v48 = vadd.f32 %v1938_v46, %v1922_v57  ;;  %v1907_v2 = vmul.f32 %v1874_v13, %v1811_v53  ;;  %v1869_v14 = vpop.permute.xlu0 %1868 }
 0x58d   : > { %v1953_v22 = vadd.f32 %v1937_v55, %v1921_v32  ;;  %v1906_v35 = vmul.f32 %v1869_v14, %v1810_v20 }
 0x58e   : > { %1970 = vst.msk [vmem:[%s2742_s30 + $0x48] sm:$0xff] %vm750_vm2, %v1954_v48  ;;  %v1924_v10 = vmul.f32 %v3194_v34, %v1907_v2 }
 0x58f   : > { %1969 = vst.msk [vmem:[%s2742_s30 + $0x40] sm:$0xff] %vm750_vm2, %v1953_v22  ;;  %v1923_v26 = vmul.f32 %v3194_v34, %v1906_v35  ;;  %v1884_v6 = vpop.permute.xlu1 %1883 }
 0x590   : > { %v1956_v9 = vadd.f32 %v1940_v52, %v1924_v10  ;;  %v1909_v25 = vmul.f32 %v1884_v6, %v1813_v1  ;;  %v1879_v12 = vpop.permute.xlu0 %1878 }
 0x591   : > { %v1955_v11 = vadd.f32 %v1939_v36, %v1923_v26  ;;  %v1908_v4 = vmul.f32 %v1879_v12, %v1812_v63 }
 0x592   : > { %1972 = vst.msk [vmem:[%s2742_s30 + $0x58] sm:$0xff] %vm750_vm2, %v1956_v9  ;;  %v1926_v0 = vmul.f32 %v3194_v34, %v1909_v25 }
 0x593   : > { %1971 = vst.msk [vmem:[%s2742_s30 + $0x50] sm:$0xff] %vm750_vm2, %v1955_v11  ;;  %v1925_v43 = vmul.f32 %v3194_v34, %v1908_v4  ;;  %v1894_v31 = vpop.permute.xlu1 %1893 }
 0x594   : > { %v1958_v60 = vadd.f32 %v1942_v39, %v1926_v0  ;;  %v1911_v8 = vmul.f32 %v1894_v31, %v1815_v41  ;;  %v1889_v44 = vpop.permute.xlu0 %1888 }
 0x595   : > { %v1957_v54 = vadd.f32 %v1941_v23, %v1925_v43  ;;  %v1910_v40 = vmul.f32 %v1889_v44, %v1814_v15 }
 0x596   : > { %1974 = vst.msk [vmem:[%s2742_s30 + $0x68] sm:$0xff] %vm750_vm2, %v1958_v60  ;;  %v1928_v24 = vmul.f32 %v3194_v34, %v1911_v8 }
 0x597   : > { %1973 = vst.msk [vmem:[%s2742_s30 + $0x60] sm:$0xff] %vm750_vm2, %v1957_v54  ;;  %v1927_v21 = vmul.f32 %v3194_v34, %v1910_v40 }
 0x598   : > { %v1960_v16 = vadd.f32 %v1944_v58, %v1928_v24 }
 0x599   : > { %v1959_v51 = vadd.f32 %v1943_v45, %v1927_v21 }
 0x59a   : > { %1976 = vst.msk [vmem:[%s2742_s30 + $0x78] sm:$0xff] %vm750_vm2, %v1960_v16 }
 0x59b   : > { %1975 = vst.msk [vmem:[%s2742_s30 + $0x70] sm:$0xff] %vm750_vm2, %v1959_v51 }
 0x59c PF: > { %s20_s17 = sadd.s32 1, %s2630_s17   ;;  %s3293_s27 = sld [smem:[#allocation7_spill]] }
 0x59d   : > { %p17_p11 = scmp.ge.s32.totalorder %s20_s17, 10   ;;  %s3294_s20 = sld [smem:[#allocation8_spill]] }
 0x59e   : > { %s3295_s11 = smov %s2618_s14  ;;  %s3296_s12 = smov %s2622_s15 }
 0x59f   : > { %s3297_s13 = smov %s2626_s16  ;;  %s3298_s14 = smov %s3302_s8 }
 0x5a0   :  { %19 = sbr.rel (!%p17_p11) target bundleno = 4 (0x4), region = 97 }
 0x5a2   : > { %s3299_s15 = smov %s3293_s27 }
 0x5a3   : > { %s3300_s16 = smov %s3294_s20 }

</bundles_post_ra>
